<compile_context>
chip_gen: v7x
topology: tpu7x:2x2x1
jax: 0.10.0
libtpu: 0.0.40
codegen_flags: <defaults>
</compile_context>

<pallas_src>
import functools
import math

import jax
import jax.numpy as jnp
from jax.experimental import pallas as pl
from jax.experimental.pallas import tpu as pltpu


def _pet_stack_kernel(
    # inputs
    node_in_ref, edge_in_ref, src_ref, dst_ref,
    wq_ref, bq_ref,
    wkv1_ref, wkv2_ref, bkv_ref,
    ww1_ref, ww2_ref, bw_ref,
    we12_ref, we3_ref, be_ref,
    gamma_ref, beta_ref,
    # outputs
    node_out_ref, edge_out_ref,
    # scratch (activation carry across layers)
    node_c, edge_c,
    *, num_nodes, num_edges, hidden, carry_feat,
):
    f32 = jnp.float32
    bf16 = jnp.bfloat16
    n, e, h, fc = num_nodes, num_edges, hidden, carry_feat
    layer = pl.program_id(0)

    # Load the original features into the VMEM carry on the first layer only.
    @pl.when(layer == 0)
    def _():
        node_c[...] = node_in_ref[...]
        edge_c[...] = edge_in_ref[...]

    node_h = node_c[...]                       # (N, Fc) f32
    edge_h = edge_c[...]                       # (E, Fc) f32
    node_bf = node_h.astype(bf16)
    edge_bf = edge_h.astype(bf16)

    # Build one-hot incidence matrices in-kernel (0/1 exact in bf16).
    src_id = src_ref[...]                      # (E, 1) int32
    dst_id = dst_ref[...]                      # (E, 1) int32
    col_n = jax.lax.broadcasted_iota(jnp.int32, (e, n), 1)
    src_oh = (col_n == src_id).astype(f32).astype(bf16)     # (E, N)
    dst_oh = (col_n == dst_id).astype(f32).astype(bf16)     # (E, N)
    col_2n = jax.lax.broadcasted_iota(jnp.int32, (e, 2 * n), 1)
    inc_sd = jnp.logical_or(col_2n == src_id, col_2n == dst_id + n)
    inc_sd = inc_sd.astype(f32).astype(bf16)                # (E, 2N): [src | dst]

    # Gather source-node features: node[src] == src_oh @ node_h  (MXU).
    h_src = jnp.dot(src_oh, node_bf, preferred_element_type=f32)       # (E, Fc)

    # src_messages = cat(node[src] * edge, node[src]); the concat is folded
    # into split weight blocks (wkv1 for the product rows, wkv2 for the rest),
    # and K|V are fused into one stacked output of width 2H.
    msg_a = (h_src * edge_h).astype(bf16)
    msg_b = h_src.astype(bf16)

    q = jnp.dot(node_bf, wq_ref[...], preferred_element_type=f32) + bq_ref[...]  # (N, H)
    kv = (jnp.dot(msg_a, wkv1_ref[...], preferred_element_type=f32)
          + jnp.dot(msg_b, wkv2_ref[...], preferred_element_type=f32)
          + bkv_ref[...])                                                         # (E, 2H)
    k = kv[:, :h]
    v = kv[:, h:]

    # fn.v_mul_e('Q', 'K', 'alpha'): destination node's Q times edge K.
    q_dst = jnp.dot(dst_oh, q.astype(bf16), preferred_element_type=f32)           # (E, H)
    alpha = q_dst * k

    # edge_softmax over incoming edges of each destination node, factored as
    #   h_n[n] = (sum_{dst(e)=n} exp(a_e) * v_e) / (sum_{dst(e)=n} exp(a_e)).
    # Per-column max keeps exp in range and leaves per-group ratios exact.
    alpha = alpha - jnp.max(alpha, axis=0, keepdims=True)
    exp_a = jnp.exp(alpha)                                                        # (E, H)
    seg_rhs = jnp.concatenate([exp_a, exp_a * v], axis=1).astype(bf16)            # (E, 2H)
    agg = jax.lax.dot_general(
        dst_oh, seg_rhs,
        dimension_numbers=(((0,), (0,)), ((), ())),          # dst_oh^T @ seg_rhs
        preferred_element_type=f32)                                               # (N, 2H)
    denom = agg[:, :h]
    unnorm = agg[:, h:]
    # EUP reciprocal; eps guards zero-in-degree nodes (unnorm is 0 there -> h_n = 0).
    inv = pl.reciprocal(jnp.maximum(denom, 1e-12), approx=True)
    h_n = unnorm * inv                                                            # (N, H)

    # Node update: W(cat(h_n, h)) with the concat folded into ww1/ww2.
    node_new = (jnp.dot(h_n.astype(bf16), ww1_ref[...], preferred_element_type=f32)
                + jnp.dot(node_bf, ww2_ref[...], preferred_element_type=f32)
                + bw_ref[...])                                                    # (N, H)

    # Edge update: edge_W(cat(h_new[src], h_new[dst], edge)) rewritten as
    #   src_oh @ (h_new @ we1) + dst_oh @ (h_new @ we2) + edge @ we3 + be,
    # with both node gathers fused into one (E, 2N) x (2N, H) matmul.
    nn_bf = node_new.astype(bf16)
    nw = jnp.dot(nn_bf, we12_ref[...], preferred_element_type=f32)                # (N, 2H)
    nw_stack = jnp.concatenate([nw[:, :h], nw[:, h:]], axis=0).astype(bf16)       # (2N, H)
    edge_new = (jnp.dot(inc_sd, nw_stack, preferred_element_type=f32)
                + jnp.dot(edge_bf, we3_ref[...], preferred_element_type=f32)
                + be_ref[...])                                                    # (E, H)

    # PET epilogue: relu_ -> shared LayerNorm(hidden) -> dropout (identity).
    gamma = gamma_ref[...]
    beta = beta_ref[...]

    def relu_ln(x):
        x = jnp.maximum(x, 0.0)
        mu = jnp.mean(x, axis=-1, keepdims=True)
        var = jnp.mean(jnp.square(x - mu), axis=-1, keepdims=True)
        return (x - mu) * jax.lax.rsqrt(var + 1e-5) * gamma + beta

    node_ln = relu_ln(node_new)                                                   # (N, H)
    edge_ln = relu_ln(edge_new)                                                   # (E, H)

    node_out_ref[...] = node_ln
    edge_out_ref[...] = edge_ln

    # Update the carry (zero-pad up to the carry width if in_feat > hidden;
    # padded columns hit zero weight rows in later layers, so results are exact).
    if fc > h:
        node_c[...] = jnp.concatenate([node_ln, jnp.zeros((n, fc - h), f32)], axis=1)
        edge_c[...] = jnp.concatenate([edge_ln, jnp.zeros((e, fc - h), f32)], axis=1)
    else:
        node_c[...] = node_ln
        edge_c[...] = edge_ln


def _pad_rows(w, rows):
    pad = rows - w.shape[0]
    if pad > 0:
        w = jnp.pad(w, ((0, pad), (0, 0)))
    return w


def init_pet_params(key, num_layers, in_feat, hidden_feat):
    """Linear-style params, pre-split/stacked for the fused kernel.

    Concat weights are stored pre-split (e.g. K's Linear(2*in, H) becomes
    wk1/wk2); K|V and we1|we2 are stacked along the output dim; all weights
    get a leading layer axis (input dims zero-padded to max(in, hidden) so
    layer 1 stacks with layers 2..L) and are stored in bf16.
    """
    h = hidden_feat
    fc = max(in_feat, hidden_feat)

    def uniform(k, shape, fan_in):
        s = 1.0 / math.sqrt(float(fan_in))
        return jax.random.uniform(k, shape, jnp.float32, -s, s)

    wq, bq, wkv1, wkv2, bkv = [], [], [], [], []
    ww1, ww2, bw, we12, we3, be = [], [], [], [], [], []
    for layer in range(num_layers):
        fin = in_feat if layer == 0 else hidden_feat
        keys = jax.random.split(jax.random.fold_in(key, layer), 16)
        # Q: Linear(fin, h)
        wq.append(_pad_rows(uniform(keys[0], (fin, h), fin), fc))
        bq.append(uniform(keys[1], (1, h), fin))
        # K, V: Linear(2*fin, h) -> split rows, stacked outputs (2h)
        wk1 = uniform(keys[2], (fin, h), 2 * fin)
        wk2 = uniform(keys[3], (fin, h), 2 * fin)
        wv1 = uniform(keys[4], (fin, h), 2 * fin)
        wv2 = uniform(keys[5], (fin, h), 2 * fin)
        wkv1.append(_pad_rows(jnp.concatenate([wk1, wv1], axis=1), fc))
        wkv2.append(_pad_rows(jnp.concatenate([wk2, wv2], axis=1), fc))
        bkv.append(jnp.concatenate([uniform(keys[6], (1, h), 2 * fin),
                                    uniform(keys[7], (1, h), 2 * fin)], axis=1))
        # W: Linear(fin + h, h) -> split rows (h_n part, node part)
        ww1.append(uniform(keys[8], (h, h), fin + h))
        ww2.append(_pad_rows(uniform(keys[9], (fin, h), fin + h), fc))
        bw.append(uniform(keys[10], (1, h), fin + h))
        # edge_W: Linear(2*h + fin, h) -> split rows; src/dst parts stacked
        we1 = uniform(keys[11], (h, h), 2 * h + fin)
        we2 = uniform(keys[12], (h, h), 2 * h + fin)
        we12.append(jnp.concatenate([we1, we2], axis=1))
        we3.append(_pad_rows(uniform(keys[13], (fin, h), 2 * h + fin), fc))
        be.append(uniform(keys[14], (1, h), 2 * h + fin))

    bf16 = jnp.bfloat16

    def stack(xs, dt):
        return jnp.stack(xs).astype(dt)

    return {
        "wq": stack(wq, bf16), "bq": stack(bq, jnp.float32),
        "wkv1": stack(wkv1, bf16), "wkv2": stack(wkv2, bf16),
        "bkv": stack(bkv, jnp.float32),
        "ww1": stack(ww1, bf16), "ww2": stack(ww2, bf16),
        "bw": stack(bw, jnp.float32),
        "we12": stack(we12, bf16), "we3": stack(we3, bf16),
        "be": stack(be, jnp.float32),
        # shared LayerNorm(hidden_feat) across layers / nodes / edges
        "gamma": jnp.ones((1, h), jnp.float32),
        "beta": jnp.zeros((1, h), jnp.float32),
    }


def pet_forward(node_h, edge_h, src, dst, params):
    """PET.forward (eval mode): the full layer stack in one pallas_call."""
    n, fin = node_h.shape
    e = edge_h.shape[0]
    num_layers, fc, h = params["wq"].shape

    if fin < fc:  # zero-pad features to the carry width (exact: weight rows are 0)
        node_h = jnp.pad(node_h, ((0, 0), (0, fc - fin)))
        edge_h = jnp.pad(edge_h, ((0, 0), (0, fc - fin)))
    node_h = node_h.astype(jnp.float32)
    edge_h = edge_h.astype(jnp.float32)
    src2 = src.astype(jnp.int32).reshape(e, 1)
    dst2 = dst.astype(jnp.int32).reshape(e, 1)

    args = (
        node_h, edge_h, src2, dst2,
        params["wq"], params["bq"],
        params["wkv1"], params["wkv2"], params["bkv"],
        params["ww1"], params["ww2"], params["bw"],
        params["we12"], params["we3"], params["be"],
        params["gamma"], params["beta"],
    )

    def fixed(shape):           # resident across all layers
        return pl.BlockSpec(shape, lambda l: (0, 0))

    def per_layer(shape):       # leading layer axis selected per grid step
        return pl.BlockSpec((None,) + shape, lambda l: (l, 0, 0))

    in_specs = [
        fixed((n, fc)), fixed((e, fc)), fixed((e, 1)), fixed((e, 1)),
        per_layer((fc, h)), per_layer((1, h)),
        per_layer((fc, 2 * h)), per_layer((fc, 2 * h)), per_layer((1, 2 * h)),
        per_layer((h, h)), per_layer((fc, h)), per_layer((1, h)),
        per_layer((h, 2 * h)), per_layer((fc, h)), per_layer((1, h)),
        fixed((1, h)), fixed((1, h)),
    ]
    out_specs = (fixed((n, h)), fixed((e, h)))
    out_shape = (jax.ShapeDtypeStruct((n, h), jnp.float32),
                 jax.ShapeDtypeStruct((e, h), jnp.float32))

    # Scoped-VMEM limit sized to the working set (defaults are far below physical).
    arg_bytes = sum(int(a.size) * a.dtype.itemsize for a in args)
    act_bytes = 4 * ((n + e) * fc + (n + e) * h)            # carries + outputs (f32)
    tmp_bytes = 4 * e * (8 * h + 3 * n) + 4 * n * 8 * h     # rough in-kernel temporaries
    vmem_limit = int(min(max(4 * (arg_bytes + act_bytes + tmp_bytes),
                             32 * 1024 * 1024),
                         64 * 1024 * 1024))

    kernel = functools.partial(
        _pet_stack_kernel,
        num_nodes=n, num_edges=e, hidden=h, carry_feat=fc)

    return pl.pallas_call(
        kernel,
        grid=(num_layers,),
        in_specs=in_specs,
        out_specs=out_specs,
        out_shape=out_shape,
        scratch_shapes=[pltpu.VMEM((n, fc), jnp.float32),
                        pltpu.VMEM((e, fc), jnp.float32)],
        compiler_params=pltpu.CompilerParams(
            dimension_semantics=("arbitrary",),
            vmem_limit_bytes=vmem_limit),
    )(*args)


if __name__ == "__main__":
    num_layers = 2
    in_feat = 32
    hidden_feat = 32
    num_nodes = 8
    num_edges = 16

    root = jax.random.PRNGKey(0)
    k_node, k_edge, k_src, k_dst, k_p = jax.random.split(root, 5)

    node_h = jax.random.normal(k_node, (num_nodes, in_feat), jnp.float32)
    edge_h = jax.random.normal(k_edge, (num_edges, in_feat), jnp.float32)
    src = jax.random.randint(k_src, (num_edges,), 0, num_nodes, jnp.int32)
    dst = jax.random.randint(k_dst, (num_edges,), 0, num_nodes, jnp.int32)

    params = init_pet_params(k_p, num_layers, in_feat, hidden_feat)

    node_out, edge_out = jax.jit(pet_forward)(node_h, edge_h, src, dst, params)
    jax.block_until_ready((node_out, edge_out))

    assert node_out.shape == (num_nodes, hidden_feat)
    assert edge_out.shape == (num_edges, hidden_feat)
    assert bool(jnp.isfinite(node_out).all())
    assert bool(jnp.isfinite(edge_out).all())
    print("KERNEL_OK")
</pallas_src>

<mosaic_0001>
module attributes {stable_mosaic.version = 11 : i64} {
  func.func @_pet_stack_kernel(%arg0: i32, %arg1: memref<8x32xf32, #tpu.memory_space<vmem>>, %arg2: memref<16x32xf32, #tpu.memory_space<vmem>>, %arg3: memref<16x1xi32, #tpu.memory_space<vmem>>, %arg4: memref<16x1xi32, #tpu.memory_space<vmem>>, %arg5: memref<1x32x32xbf16, #tpu.memory_space<vmem>>, %arg6: memref<1x1x32xf32, #tpu.memory_space<vmem>>, %arg7: memref<1x32x64xbf16, #tpu.memory_space<vmem>>, %arg8: memref<1x32x64xbf16, #tpu.memory_space<vmem>>, %arg9: memref<1x1x64xf32, #tpu.memory_space<vmem>>, %arg10: memref<1x32x32xbf16, #tpu.memory_space<vmem>>, %arg11: memref<1x32x32xbf16, #tpu.memory_space<vmem>>, %arg12: memref<1x1x32xf32, #tpu.memory_space<vmem>>, %arg13: memref<1x32x64xbf16, #tpu.memory_space<vmem>>, %arg14: memref<1x32x32xbf16, #tpu.memory_space<vmem>>, %arg15: memref<1x1x32xf32, #tpu.memory_space<vmem>>, %arg16: memref<1x32xf32, #tpu.memory_space<vmem>>, %arg17: memref<1x32xf32, #tpu.memory_space<vmem>>, %arg18: memref<8x32xf32, #tpu.memory_space<vmem>>, %arg19: memref<16x32xf32, #tpu.memory_space<vmem>>, %arg20: memref<8x32xf32, #tpu.memory_space<vmem>>, %arg21: memref<16x32xf32, #tpu.memory_space<vmem>>) attributes {dimension_semantics = [#tpu.dimension_semantics<arbitrary>], iteration_bounds = array<i64: 2>, scalar_prefetch = 0 : i64, scratch_operands = 2 : i64, tpu.core_type = #tpu.core_type<tc>, window_params = [{pipeline_mode = #tpu.pipeline_mode<synchronous>, transform_indices = @transform_0, window_bounds = array<i64: 8, 32>}, {pipeline_mode = #tpu.pipeline_mode<synchronous>, transform_indices = @transform_1, window_bounds = array<i64: 16, 32>}, {pipeline_mode = #tpu.pipeline_mode<synchronous>, transform_indices = @transform_2, window_bounds = array<i64: 16, 1>}, {pipeline_mode = #tpu.pipeline_mode<synchronous>, transform_indices = @transform_3, window_bounds = array<i64: 16, 1>}, {transform_indices = @transform_4, window_bounds = array<i64: 1, 32, 32>}, {transform_indices = @transform_5, window_bounds = array<i64: 1, 1, 32>}, {transform_indices = @transform_6, window_bounds = array<i64: 1, 32, 64>}, {transform_indices = @transform_7, window_bounds = array<i64: 1, 32, 64>}, {transform_indices = @transform_8, window_bounds = array<i64: 1, 1, 64>}, {transform_indices = @transform_9, window_bounds = array<i64: 1, 32, 32>}, {transform_indices = @transform_10, window_bounds = array<i64: 1, 32, 32>}, {transform_indices = @transform_11, window_bounds = array<i64: 1, 1, 32>}, {transform_indices = @transform_12, window_bounds = array<i64: 1, 32, 64>}, {transform_indices = @transform_13, window_bounds = array<i64: 1, 32, 32>}, {transform_indices = @transform_14, window_bounds = array<i64: 1, 1, 32>}, {pipeline_mode = #tpu.pipeline_mode<synchronous>, transform_indices = @transform_15, window_bounds = array<i64: 1, 32>}, {pipeline_mode = #tpu.pipeline_mode<synchronous>, transform_indices = @transform_16, window_bounds = array<i64: 1, 32>}, {pipeline_mode = #tpu.pipeline_mode<synchronous>, transform_indices = @transform_17, window_bounds = array<i64: 8, 32>}, {pipeline_mode = #tpu.pipeline_mode<synchronous>, transform_indices = @transform_18, window_bounds = array<i64: 16, 32>}]} {
    %c0_i32 = arith.constant 0 : i32
    %0 = arith.cmpi eq, %arg0, %c0_i32 : i32
    %1 = arith.extui %0 : i1 to i32
    %c0_i32_0 = arith.constant 0 : i32
    %2 = arith.cmpi ne, %1, %c0_i32_0 : i32
    scf.if %2 {
      %c0_77 = arith.constant 0 : index
      %c0_78 = arith.constant 0 : index
      %156 = vector.load %arg1[%c0_77, %c0_78] : memref<8x32xf32, #tpu.memory_space<vmem>>, vector<8x32xf32>
      %c0_79 = arith.constant 0 : index
      %c0_80 = arith.constant 0 : index
      %157 = vector.load %arg20[%c0_79, %c0_80] : memref<8x32xf32, #tpu.memory_space<vmem>>, vector<8x32xf32>
      tpu.vector_store %arg20[%c0_79, %c0_80], %156 {strides = array<i32>} : memref<8x32xf32, #tpu.memory_space<vmem>>, vector<8x32xf32>,
      %c0_81 = arith.constant 0 : index
      %c0_82 = arith.constant 0 : index
      %158 = vector.load %arg2[%c0_81, %c0_82] : memref<16x32xf32, #tpu.memory_space<vmem>>, vector<16x32xf32>
      %c0_83 = arith.constant 0 : index
      %c0_84 = arith.constant 0 : index
      %159 = vector.load %arg21[%c0_83, %c0_84] : memref<16x32xf32, #tpu.memory_space<vmem>>, vector<16x32xf32>
      tpu.vector_store %arg21[%c0_83, %c0_84], %158 {strides = array<i32>} : memref<16x32xf32, #tpu.memory_space<vmem>>, vector<16x32xf32>,
    } else {
    }
    %c0 = arith.constant 0 : index
    %c0_1 = arith.constant 0 : index
    %3 = vector.load %arg20[%c0, %c0_1] : memref<8x32xf32, #tpu.memory_space<vmem>>, vector<8x32xf32>
    %c0_2 = arith.constant 0 : index
    %c0_3 = arith.constant 0 : index
    %4 = vector.load %arg21[%c0_2, %c0_3] : memref<16x32xf32, #tpu.memory_space<vmem>>, vector<16x32xf32>
    %5 = arith.truncf %3 : vector<8x32xf32> to vector<8x32xbf16>
    %6 = arith.truncf %4 : vector<16x32xf32> to vector<16x32xbf16>
    %c0_4 = arith.constant 0 : index
    %c0_5 = arith.constant 0 : index
    %7 = vector.load %arg3[%c0_4, %c0_5] : memref<16x1xi32, #tpu.memory_space<vmem>>, vector<16x1xi32>
    %c0_6 = arith.constant 0 : index
    %c0_7 = arith.constant 0 : index
    %8 = vector.load %arg4[%c0_6, %c0_7] : memref<16x1xi32, #tpu.memory_space<vmem>>, vector<16x1xi32>
    %9 = tpu.iota {dimensions = array<i32: 1>} : vector<16x8xi32>
    %10 = vector.broadcast %7 : vector<16x1xi32> to vector<16x8xi32>
    %11 = arith.cmpi eq, %9, %10 : vector<16x8xi32>
    %12 = arith.extui %11 : vector<16x8xi1> to vector<16x8xi32>
    %13 = arith.sitofp %12 : vector<16x8xi32> to vector<16x8xf32>
    %14 = arith.truncf %13 : vector<16x8xf32> to vector<16x8xbf16>
    %15 = vector.broadcast %8 : vector<16x1xi32> to vector<16x8xi32>
    %16 = arith.cmpi eq, %9, %15 : vector<16x8xi32>
    %17 = arith.extui %16 : vector<16x8xi1> to vector<16x8xi32>
    %18 = arith.sitofp %17 : vector<16x8xi32> to vector<16x8xf32>
    %19 = arith.truncf %18 : vector<16x8xf32> to vector<16x8xbf16>
    %20 = tpu.iota {dimensions = array<i32: 1>} : vector<16x16xi32>
    %21 = vector.broadcast %7 : vector<16x1xi32> to vector<16x16xi32>
    %22 = arith.cmpi eq, %20, %21 : vector<16x16xi32>
    %c8_i32 = arith.constant 8 : i32
    %23 = vector.broadcast %c8_i32 : i32 to vector<16x1xi32>
    %24 = arith.addi %8, %23 : vector<16x1xi32>
    %25 = vector.broadcast %24 : vector<16x1xi32> to vector<16x16xi32>
    %26 = arith.cmpi eq, %20, %25 : vector<16x16xi32>
    %27 = arith.ori %22, %26 : vector<16x16xi1>
    %28 = arith.extui %27 : vector<16x16xi1> to vector<16x16xi32>
    %29 = arith.sitofp %28 : vector<16x16xi32> to vector<16x16xf32>
    %30 = arith.truncf %29 : vector<16x16xf32> to vector<16x16xbf16>
    %cst = arith.constant dense<0.000000e+00> : vector<16x32xf32>
    %31 = tpu.matmul %14, %5, %cst {dimension_numbers = #tpu.dot_dimension_numbers<[1], [0], [0], [1], [0, 0, 1, 1], [], []>} : vector<16x8xbf16>, vector<8x32xbf16>, vector<16x32xf32> -> vector<16x32xf32>
    %32 = arith.mulf %31, %4 : vector<16x32xf32>
    %33 = arith.truncf %32 : vector<16x32xf32> to vector<16x32xbf16>
    %34 = arith.truncf %31 : vector<16x32xf32> to vector<16x32xbf16>
    %c0_8 = arith.constant 0 : index
    %c0_9 = arith.constant 0 : index
    %c0_10 = arith.constant 0 : index
    %35 = vector.load %arg5[%c0_8, %c0_9, %c0_10] : memref<1x32x32xbf16, #tpu.memory_space<vmem>>, vector<1x32x32xbf16>
    %36 = vector.shape_cast %35 : vector<1x32x32xbf16> to vector<32x32xbf16>
    %cst_11 = arith.constant dense<0.000000e+00> : vector<8x32xf32>
    %37 = tpu.matmul %5, %36, %cst_11 {dimension_numbers = #tpu.dot_dimension_numbers<[1], [0], [0], [1], [0, 0, 1, 1], [], []>} : vector<8x32xbf16>, vector<32x32xbf16>, vector<8x32xf32> -> vector<8x32xf32>
    %c0_12 = arith.constant 0 : index
    %c0_13 = arith.constant 0 : index
    %c0_14 = arith.constant 0 : index
    %38 = vector.load %arg6[%c0_12, %c0_13, %c0_14] : memref<1x1x32xf32, #tpu.memory_space<vmem>>, vector<1x1x32xf32>
    %39 = vector.shape_cast %38 : vector<1x1x32xf32> to vector<1x32xf32>
    %40 = vector.broadcast %39 : vector<1x32xf32> to vector<8x32xf32>
    %41 = arith.addf %37, %40 : vector<8x32xf32>
    %c0_15 = arith.constant 0 : index
    %c0_16 = arith.constant 0 : index
    %c0_17 = arith.constant 0 : index
    %42 = vector.load %arg7[%c0_15, %c0_16, %c0_17] : memref<1x32x64xbf16, #tpu.memory_space<vmem>>, vector<1x32x64xbf16>
    %43 = vector.shape_cast %42 : vector<1x32x64xbf16> to vector<32x64xbf16>
    %cst_18 = arith.constant dense<0.000000e+00> : vector<16x64xf32>
    %44 = tpu.matmul %33, %43, %cst_18 {dimension_numbers = #tpu.dot_dimension_numbers<[1], [0], [0], [1], [0, 0, 1, 1], [], []>} : vector<16x32xbf16>, vector<32x64xbf16>, vector<16x64xf32> -> vector<16x64xf32>
    %c0_19 = arith.constant 0 : index
    %c0_20 = arith.constant 0 : index
    %c0_21 = arith.constant 0 : index
    %45 = vector.load %arg8[%c0_19, %c0_20, %c0_21] : memref<1x32x64xbf16, #tpu.memory_space<vmem>>, vector<1x32x64xbf16>
    %46 = vector.shape_cast %45 : vector<1x32x64xbf16> to vector<32x64xbf16>
    %cst_22 = arith.constant dense<0.000000e+00> : vector<16x64xf32>
    %47 = tpu.matmul %34, %46, %cst_22 {dimension_numbers = #tpu.dot_dimension_numbers<[1], [0], [0], [1], [0, 0, 1, 1], [], []>} : vector<16x32xbf16>, vector<32x64xbf16>, vector<16x64xf32> -> vector<16x64xf32>
    %48 = arith.addf %44, %47 : vector<16x64xf32>
    %c0_23 = arith.constant 0 : index
    %c0_24 = arith.constant 0 : index
    %c0_25 = arith.constant 0 : index
    %49 = vector.load %arg9[%c0_23, %c0_24, %c0_25] : memref<1x1x64xf32, #tpu.memory_space<vmem>>, vector<1x1x64xf32>
    %50 = vector.shape_cast %49 : vector<1x1x64xf32> to vector<1x64xf32>
    %51 = vector.broadcast %50 : vector<1x64xf32> to vector<16x64xf32>
    %52 = arith.addf %48, %51 : vector<16x64xf32>
    %53 = vector.extract_strided_slice %52 {offsets = [0, 0], sizes = [16, 32], strides = [1, 1]} : vector<16x64xf32> to vector<16x32xf32>
    %54 = vector.extract_strided_slice %52 {offsets = [0, 32], sizes = [16, 32], strides = [1, 1]} : vector<16x64xf32> to vector<16x32xf32>
    %55 = arith.truncf %41 : vector<8x32xf32> to vector<8x32xbf16>
    %cst_26 = arith.constant dense<0.000000e+00> : vector<16x32xf32>
    %56 = tpu.matmul %19, %55, %cst_26 {dimension_numbers = #tpu.dot_dimension_numbers<[1], [0], [0], [1], [0, 0, 1, 1], [], []>} : vector<16x8xbf16>, vector<8x32xbf16>, vector<16x32xf32> -> vector<16x32xf32>
    %57 = arith.mulf %56, %53 : vector<16x32xf32>
    %cst_27 = arith.constant dense<0xFF800000> : vector<32xf32>
    %58 = vector.multi_reduction <maximumf>, %57, %cst_27 [0] : vector<16x32xf32> to vector<32xf32>
    %59 = vector.shape_cast %58 : vector<32xf32> to vector<1x32xf32>
    %60 = vector.broadcast %59 : vector<1x32xf32> to vector<16x32xf32>
    %61 = arith.subf %57, %60 : vector<16x32xf32>
    %62 = math.exp %61 : vector<16x32xf32>
    %63 = arith.mulf %62, %54 : vector<16x32xf32>
    %64 = tpu.concatenate %62, %63 in 1 : vector<16x32xf32>, vector<16x32xf32> -> vector<16x64xf32>
    %65 = arith.truncf %64 : vector<16x64xf32> to vector<16x64xbf16>
    %cst_28 = arith.constant dense<0.000000e+00> : vector<8x64xf32>
    %66 = tpu.matmul %19, %65, %cst_28 {dimension_numbers = #tpu.dot_dimension_numbers<[0], [0], [1], [1], [0, 1, 1, 1], [], []>} : vector<16x8xbf16>, vector<16x64xbf16>, vector<8x64xf32> -> vector<8x64xf32>
    %67 = vector.extract_strided_slice %66 {offsets = [0, 0], sizes = [8, 32], strides = [1, 1]} : vector<8x64xf32> to vector<8x32xf32>
    %68 = vector.extract_strided_slice %66 {offsets = [0, 32], sizes = [8, 32], strides = [1, 1]} : vector<8x64xf32> to vector<8x32xf32>
    %cst_29 = arith.constant 9.99999996E-13 : f32
    %69 = vector.broadcast %cst_29 : f32 to vector<8x32xf32>
    %70 = arith.maximumf %67, %69 : vector<8x32xf32>
    %71 = tpu.reciprocal %70 {approx = true} : vector<8x32xf32> -> vector<8x32xf32>
    %72 = arith.mulf %68, %71 : vector<8x32xf32>
    %73 = arith.truncf %72 : vector<8x32xf32> to vector<8x32xbf16>
    %c0_30 = arith.constant 0 : index
    %c0_31 = arith.constant 0 : index
    %c0_32 = arith.constant 0 : index
    %74 = vector.load %arg10[%c0_30, %c0_31, %c0_32] : memref<1x32x32xbf16, #tpu.memory_space<vmem>>, vector<1x32x32xbf16>
    %75 = vector.shape_cast %74 : vector<1x32x32xbf16> to vector<32x32xbf16>
    %cst_33 = arith.constant dense<0.000000e+00> : vector<8x32xf32>
    %76 = tpu.matmul %73, %75, %cst_33 {dimension_numbers = #tpu.dot_dimension_numbers<[1], [0], [0], [1], [0, 0, 1, 1], [], []>} : vector<8x32xbf16>, vector<32x32xbf16>, vector<8x32xf32> -> vector<8x32xf32>
    %c0_34 = arith.constant 0 : index
    %c0_35 = arith.constant 0 : index
    %c0_36 = arith.constant 0 : index
    %77 = vector.load %arg11[%c0_34, %c0_35, %c0_36] : memref<1x32x32xbf16, #tpu.memory_space<vmem>>, vector<1x32x32xbf16>
    %78 = vector.shape_cast %77 : vector<1x32x32xbf16> to vector<32x32xbf16>
    %cst_37 = arith.constant dense<0.000000e+00> : vector<8x32xf32>
    %79 = tpu.matmul %5, %78, %cst_37 {dimension_numbers = #tpu.dot_dimension_numbers<[1], [0], [0], [1], [0, 0, 1, 1], [], []>} : vector<8x32xbf16>, vector<32x32xbf16>, vector<8x32xf32> -> vector<8x32xf32>
    %80 = arith.addf %76, %79 : vector<8x32xf32>
    %c0_38 = arith.constant 0 : index
    %c0_39 = arith.constant 0 : index
    %c0_40 = arith.constant 0 : index
    %81 = vector.load %arg12[%c0_38, %c0_39, %c0_40] : memref<1x1x32xf32, #tpu.memory_space<vmem>>, vector<1x1x32xf32>
    %82 = vector.shape_cast %81 : vector<1x1x32xf32> to vector<1x32xf32>
    %83 = vector.broadcast %82 : vector<1x32xf32> to vector<8x32xf32>
    %84 = arith.addf %80, %83 : vector<8x32xf32>
    %85 = arith.truncf %84 : vector<8x32xf32> to vector<8x32xbf16>
    %c0_41 = arith.constant 0 : index
    %c0_42 = arith.constant 0 : index
    %c0_43 = arith.constant 0 : index
    %86 = vector.load %arg13[%c0_41, %c0_42, %c0_43] : memref<1x32x64xbf16, #tpu.memory_space<vmem>>, vector<1x32x64xbf16>
    %87 = vector.shape_cast %86 : vector<1x32x64xbf16> to vector<32x64xbf16>
    %cst_44 = arith.constant dense<0.000000e+00> : vector<8x64xf32>
    %88 = tpu.matmul %85, %87, %cst_44 {dimension_numbers = #tpu.dot_dimension_numbers<[1], [0], [0], [1], [0, 0, 1, 1], [], []>} : vector<8x32xbf16>, vector<32x64xbf16>, vector<8x64xf32> -> vector<8x64xf32>
    %89 = vector.extract_strided_slice %88 {offsets = [0, 0], sizes = [8, 32], strides = [1, 1]} : vector<8x64xf32> to vector<8x32xf32>
    %90 = vector.extract_strided_slice %88 {offsets = [0, 32], sizes = [8, 32], strides = [1, 1]} : vector<8x64xf32> to vector<8x32xf32>
    %91 = tpu.concatenate %89, %90 in 0 : vector<8x32xf32>, vector<8x32xf32> -> vector<16x32xf32>
    %92 = arith.truncf %91 : vector<16x32xf32> to vector<16x32xbf16>
    %cst_45 = arith.constant dense<0.000000e+00> : vector<16x32xf32>
    %93 = tpu.matmul %30, %92, %cst_45 {dimension_numbers = #tpu.dot_dimension_numbers<[1], [0], [0], [1], [0, 0, 1, 1], [], []>} : vector<16x16xbf16>, vector<16x32xbf16>, vector<16x32xf32> -> vector<16x32xf32>
    %c0_46 = arith.constant 0 : index
    %c0_47 = arith.constant 0 : index
    %c0_48 = arith.constant 0 : index
    %94 = vector.load %arg14[%c0_46, %c0_47, %c0_48] : memref<1x32x32xbf16, #tpu.memory_space<vmem>>, vector<1x32x32xbf16>
    %95 = vector.shape_cast %94 : vector<1x32x32xbf16> to vector<32x32xbf16>
    %cst_49 = arith.constant dense<0.000000e+00> : vector<16x32xf32>
    %96 = tpu.matmul %6, %95, %cst_49 {dimension_numbers = #tpu.dot_dimension_numbers<[1], [0], [0], [1], [0, 0, 1, 1], [], []>} : vector<16x32xbf16>, vector<32x32xbf16>, vector<16x32xf32> -> vector<16x32xf32>
    %97 = arith.addf %93, %96 : vector<16x32xf32>
    %c0_50 = arith.constant 0 : index
    %c0_51 = arith.constant 0 : index
    %c0_52 = arith.constant 0 : index
    %98 = vector.load %arg15[%c0_50, %c0_51, %c0_52] : memref<1x1x32xf32, #tpu.memory_space<vmem>>, vector<1x1x32xf32>
    %99 = vector.shape_cast %98 : vector<1x1x32xf32> to vector<1x32xf32>
    %100 = vector.broadcast %99 : vector<1x32xf32> to vector<16x32xf32>
    %101 = arith.addf %97, %100 : vector<16x32xf32>
    %c0_53 = arith.constant 0 : index
    %c0_54 = arith.constant 0 : index
    %102 = vector.load %arg16[%c0_53, %c0_54] : memref<1x32xf32, #tpu.memory_space<vmem>>, vector<1x32xf32>
    %c0_55 = arith.constant 0 : index
    %c0_56 = arith.constant 0 : index
    %103 = vector.load %arg17[%c0_55, %c0_56] : memref<1x32xf32, #tpu.memory_space<vmem>>, vector<1x32xf32>
    %cst_57 = arith.constant 0.000000e+00 : f32
    %104 = vector.broadcast %cst_57 : f32 to vector<8x32xf32>
    %105 = arith.maximumf %84, %104 : vector<8x32xf32>
    %cst_58 = arith.constant dense<0.000000e+00> : vector<8xf32>
    %106 = vector.multi_reduction <add>, %105, %cst_58 [1] : vector<8x32xf32> to vector<8xf32>
    %107 = vector.shape_cast %106 : vector<8xf32> to vector<8x1xf32>
    %cst_59 = arith.constant 3.200000e+01 : f32
    %108 = vector.broadcast %cst_59 : f32 to vector<8x1xf32>
    %109 = arith.divf %107, %108 : vector<8x1xf32>
    %110 = vector.broadcast %109 : vector<8x1xf32> to vector<8x32xf32>
    %111 = arith.subf %105, %110 : vector<8x32xf32>
    %112 = arith.mulf %111, %111 : vector<8x32xf32>
    %cst_60 = arith.constant dense<0.000000e+00> : vector<8xf32>
    %113 = vector.multi_reduction <add>, %112, %cst_60 [1] : vector<8x32xf32> to vector<8xf32>
    %114 = vector.shape_cast %113 : vector<8xf32> to vector<8x1xf32>
    %cst_61 = arith.constant 3.200000e+01 : f32
    %115 = vector.broadcast %cst_61 : f32 to vector<8x1xf32>
    %116 = arith.divf %114, %115 : vector<8x1xf32>
    %117 = vector.broadcast %109 : vector<8x1xf32> to vector<8x32xf32>
    %118 = arith.subf %105, %117 : vector<8x32xf32>
    %cst_62 = arith.constant 9.99999974E-6 : f32
    %119 = vector.broadcast %cst_62 : f32 to vector<8x1xf32>
    %120 = arith.addf %116, %119 : vector<8x1xf32>
    %121 = math.rsqrt %120 : vector<8x1xf32>
    %122 = vector.broadcast %121 : vector<8x1xf32> to vector<8x32xf32>
    %123 = arith.mulf %118, %122 : vector<8x32xf32>
    %124 = vector.broadcast %102 : vector<1x32xf32> to vector<8x32xf32>
    %125 = arith.mulf %123, %124 : vector<8x32xf32>
    %126 = vector.broadcast %103 : vector<1x32xf32> to vector<8x32xf32>
    %127 = arith.addf %125, %126 : vector<8x32xf32>
    %cst_63 = arith.constant 0.000000e+00 : f32
    %128 = vector.broadcast %cst_63 : f32 to vector<16x32xf32>
    %129 = arith.maximumf %101, %128 : vector<16x32xf32>
    %cst_64 = arith.constant dense<0.000000e+00> : vector<16xf32>
    %130 = vector.multi_reduction <add>, %129, %cst_64 [1] : vector<16x32xf32> to vector<16xf32>
    %131 = vector.shape_cast %130 : vector<16xf32> to vector<16x1xf32>
    %cst_65 = arith.constant 3.200000e+01 : f32
    %132 = vector.broadcast %cst_65 : f32 to vector<16x1xf32>
    %133 = arith.divf %131, %132 : vector<16x1xf32>
    %134 = vector.broadcast %133 : vector<16x1xf32> to vector<16x32xf32>
    %135 = arith.subf %129, %134 : vector<16x32xf32>
    %136 = arith.mulf %135, %135 : vector<16x32xf32>
    %cst_66 = arith.constant dense<0.000000e+00> : vector<16xf32>
    %137 = vector.multi_reduction <add>, %136, %cst_66 [1] : vector<16x32xf32> to vector<16xf32>
    %138 = vector.shape_cast %137 : vector<16xf32> to vector<16x1xf32>
    %cst_67 = arith.constant 3.200000e+01 : f32
    %139 = vector.broadcast %cst_67 : f32 to vector<16x1xf32>
    %140 = arith.divf %138, %139 : vector<16x1xf32>
    %141 = vector.broadcast %133 : vector<16x1xf32> to vector<16x32xf32>
    %142 = arith.subf %129, %141 : vector<16x32xf32>
    %cst_68 = arith.constant 9.99999974E-6 : f32
    %143 = vector.broadcast %cst_68 : f32 to vector<16x1xf32>
    %144 = arith.addf %140, %143 : vector<16x1xf32>
    %145 = math.rsqrt %144 : vector<16x1xf32>
    %146 = vector.broadcast %145 : vector<16x1xf32> to vector<16x32xf32>
    %147 = arith.mulf %142, %146 : vector<16x32xf32>
    %148 = vector.broadcast %102 : vector<1x32xf32> to vector<16x32xf32>
    %149 = arith.mulf %147, %148 : vector<16x32xf32>
    %150 = vector.broadcast %103 : vector<1x32xf32> to vector<16x32xf32>
    %151 = arith.addf %149, %150 : vector<16x32xf32>
    %c0_69 = arith.constant 0 : index
    %c0_70 = arith.constant 0 : index
    %152 = vector.load %arg18[%c0_69, %c0_70] : memref<8x32xf32, #tpu.memory_space<vmem>>, vector<8x32xf32>
    tpu.vector_store %arg18[%c0_69, %c0_70], %127 {strides = array<i32>} : memref<8x32xf32, #tpu.memory_space<vmem>>, vector<8x32xf32>,
    %c0_71 = arith.constant 0 : index
    %c0_72 = arith.constant 0 : index
    %153 = vector.load %arg19[%c0_71, %c0_72] : memref<16x32xf32, #tpu.memory_space<vmem>>, vector<16x32xf32>
    tpu.vector_store %arg19[%c0_71, %c0_72], %151 {strides = array<i32>} : memref<16x32xf32, #tpu.memory_space<vmem>>, vector<16x32xf32>,
    %c0_73 = arith.constant 0 : index
    %c0_74 = arith.constant 0 : index
    %154 = vector.load %arg20[%c0_73, %c0_74] : memref<8x32xf32, #tpu.memory_space<vmem>>, vector<8x32xf32>
    tpu.vector_store %arg20[%c0_73, %c0_74], %127 {strides = array<i32>} : memref<8x32xf32, #tpu.memory_space<vmem>>, vector<8x32xf32>,
    %c0_75 = arith.constant 0 : index
    %c0_76 = arith.constant 0 : index
    %155 = vector.load %arg21[%c0_75, %c0_76] : memref<16x32xf32, #tpu.memory_space<vmem>>, vector<16x32xf32>
    tpu.vector_store %arg21[%c0_75, %c0_76], %151 {strides = array<i32>} : memref<16x32xf32, #tpu.memory_space<vmem>>, vector<16x32xf32>,
    return
  }
  func.func @transform_0(%arg0: i32) -> (i32, i32) {
    %c0_i32 = arith.constant 0 : i32
    %c0_i32_0 = arith.constant 0 : i32
    %c0_i32_1 = arith.constant 0 : i32
    return %c0_i32, %c0_i32_0 : i32, i32
  }
  func.func @transform_1(%arg0: i32) -> (i32, i32) {
    %c0_i32 = arith.constant 0 : i32
    %c0_i32_0 = arith.constant 0 : i32
    %c0_i32_1 = arith.constant 0 : i32
    return %c0_i32, %c0_i32_0 : i32, i32
  }
  func.func @transform_2(%arg0: i32) -> (i32, i32) {
    %c0_i32 = arith.constant 0 : i32
    %c0_i32_0 = arith.constant 0 : i32
    %c0_i32_1 = arith.constant 0 : i32
    return %c0_i32, %c0_i32_0 : i32, i32
  }
  func.func @transform_3(%arg0: i32) -> (i32, i32) {
    %c0_i32 = arith.constant 0 : i32
    %c0_i32_0 = arith.constant 0 : i32
    %c0_i32_1 = arith.constant 0 : i32
    return %c0_i32, %c0_i32_0 : i32, i32
  }
  func.func @transform_4(%arg0: i32) -> (i32, i32, i32) {
    %c0_i32 = arith.constant 0 : i32
    %c0_i32_0 = arith.constant 0 : i32
    %c0_i32_1 = arith.constant 0 : i32
    return %arg0, %c0_i32, %c0_i32_0 : i32, i32, i32
  }
  func.func @transform_5(%arg0: i32) -> (i32, i32, i32) {
    %c0_i32 = arith.constant 0 : i32
    %c0_i32_0 = arith.constant 0 : i32
    %c0_i32_1 = arith.constant 0 : i32
    return %arg0, %c0_i32, %c0_i32_0 : i32, i32, i32
  }
  func.func @transform_6(%arg0: i32) -> (i32, i32, i32) {
    %c0_i32 = arith.constant 0 : i32
    %c0_i32_0 = arith.constant 0 : i32
    %c0_i32_1 = arith.constant 0 : i32
    return %arg0, %c0_i32, %c0_i32_0 : i32, i32, i32
  }
  func.func @transform_7(%arg0: i32) -> (i32, i32, i32) {
    %c0_i32 = arith.constant 0 : i32
    %c0_i32_0 = arith.constant 0 : i32
    %c0_i32_1 = arith.constant 0 : i32
    return %arg0, %c0_i32, %c0_i32_0 : i32, i32, i32
  }
  func.func @transform_8(%arg0: i32) -> (i32, i32, i32) {
    %c0_i32 = arith.constant 0 : i32
    %c0_i32_0 = arith.constant 0 : i32
    %c0_i32_1 = arith.constant 0 : i32
    return %arg0, %c0_i32, %c0_i32_0 : i32, i32, i32
  }
  func.func @transform_9(%arg0: i32) -> (i32, i32, i32) {
    %c0_i32 = arith.constant 0 : i32
    %c0_i32_0 = arith.constant 0 : i32
    %c0_i32_1 = arith.constant 0 : i32
    return %arg0, %c0_i32, %c0_i32_0 : i32, i32, i32
  }
  func.func @transform_10(%arg0: i32) -> (i32, i32, i32) {
    %c0_i32 = arith.constant 0 : i32
    %c0_i32_0 = arith.constant 0 : i32
    %c0_i32_1 = arith.constant 0 : i32
    return %arg0, %c0_i32, %c0_i32_0 : i32, i32, i32
  }
  func.func @transform_11(%arg0: i32) -> (i32, i32, i32) {
    %c0_i32 = arith.constant 0 : i32
    %c0_i32_0 = arith.constant 0 : i32
    %c0_i32_1 = arith.constant 0 : i32
    return %arg0, %c0_i32, %c0_i32_0 : i32, i32, i32
  }
  func.func @transform_12(%arg0: i32) -> (i32, i32, i32) {
    %c0_i32 = arith.constant 0 : i32
    %c0_i32_0 = arith.constant 0 : i32
    %c0_i32_1 = arith.constant 0 : i32
    return %arg0, %c0_i32, %c0_i32_0 : i32, i32, i32
  }
  func.func @transform_13(%arg0: i32) -> (i32, i32, i32) {
    %c0_i32 = arith.constant 0 : i32
    %c0_i32_0 = arith.constant 0 : i32
    %c0_i32_1 = arith.constant 0 : i32
    return %arg0, %c0_i32, %c0_i32_0 : i32, i32, i32
  }
  func.func @transform_14(%arg0: i32) -> (i32, i32, i32) {
    %c0_i32 = arith.constant 0 : i32
    %c0_i32_0 = arith.constant 0 : i32
    %c0_i32_1 = arith.constant 0 : i32
    return %arg0, %c0_i32, %c0_i32_0 : i32, i32, i32
  }
  func.func @transform_15(%arg0: i32) -> (i32, i32) {
    %c0_i32 = arith.constant 0 : i32
    %c0_i32_0 = arith.constant 0 : i32
    %c0_i32_1 = arith.constant 0 : i32
    return %c0_i32, %c0_i32_0 : i32, i32
  }
  func.func @transform_16(%arg0: i32) -> (i32, i32) {
    %c0_i32 = arith.constant 0 : i32
    %c0_i32_0 = arith.constant 0 : i32
    %c0_i32_1 = arith.constant 0 : i32
    return %c0_i32, %c0_i32_0 : i32, i32
  }
  func.func @transform_17(%arg0: i32) -> (i32, i32) {
    %c0_i32 = arith.constant 0 : i32
    %c0_i32_0 = arith.constant 0 : i32
    %c0_i32_1 = arith.constant 0 : i32
    return %c0_i32, %c0_i32_0 : i32, i32
  }
  func.func @transform_18(%arg0: i32) -> (i32, i32) {
    %c0_i32 = arith.constant 0 : i32
    %c0_i32_0 = arith.constant 0 : i32
    %c0_i32_1 = arith.constant 0 : i32
    return %c0_i32, %c0_i32_0 : i32, i32
  }
}

</mosaic_0001>

<bundles_post_ra>
// kernel: pet_forward.1
= control target key start
LH: loop header
LB: loop body
LE: loop exit
PB: predicated region body
PF: predicated region fallthrough
CT: control target
= control target key end

     0   :  { %s3614_s0 = inlined_call_operand.hbm [shape: f32[8,32], index: 0, kind: input, shape index: {}]   ;;  %s3615_s1 = inlined_call_operand.hbm [shape: f32[16,32], index: 1, kind: input, shape index: {}]   ;;  %s3616_s2 = inlined_call_operand.vmem [shape: s32[16,1], index: 2, kind: input, shape index: {}]   ;;  %s3617_s3 = inlined_call_operand.vmem [shape: s32[16,1], index: 3, kind: input, shape index: {}]   ;;  %s3618_s4 = inlined_call_operand.vmem [shape: bf16[2,32,32], index: 4, kind: input, shape index: {}]   ;;  %s3619_s5 = inlined_call_operand.vmem [shape: f32[2,1,32], index: 5, kind: input, shape index: {}]   ;;  %s3620_s6 = inlined_call_operand.vmem [shape: bf16[2,32,64], index: 6, kind: input, shape index: {}]   ;;  %s3621_s7 = inlined_call_operand.hbm [shape: bf16[2,32,64], index: 7, kind: input, shape index: {}]   ;;  %s3622_s8 = inlined_call_operand.hbm [shape: f32[2,1,64], index: 8, kind: input, shape index: {}]   ;;  %s3623_s9 = inlined_call_operand.vmem [shape: bf16[2,32,32], index: 9, kind: input, shape index: {}]   ;;  %s3624_s10 = inlined_call_operand.hbm [shape: bf16[2,32,32], index: 10, kind: input, shape index: {}]   ;;  %s3625_s11 = inlined_call_operand.hbm [shape: f32[2,1,32], index: 11, kind: input, shape index: {}]   ;;  %s3626_s12 = inlined_call_operand.hbm [shape: bf16[2,32,64], index: 12, kind: input, shape index: {}]   ;;  %s3627_s13 = inlined_call_operand.hbm [shape: bf16[2,32,32], index: 13, kind: input, shape index: {}]   ;;  %s3628_s14 = inlined_call_operand.hbm [shape: f32[2,1,32], index: 14, kind: input, shape index: {}]   ;;  %s3629_s15 = inlined_call_operand.hbm [shape: f32[1,32], index: 15, kind: input, shape index: {}]   ;;  %s3630_s16 = inlined_call_operand.hbm [shape: f32[1,32], index: 16, kind: input, shape index: {}]   ;;  %s3631_s17 = inlined_call_operand.hbm [shape: f32[8,32], index: 17, kind: output, shape index: {0}]   ;;  %s3632_s18 = inlined_call_operand.hbm [shape: f32[16,32], index: 18, kind: output, shape index: {1}]  }
   0x1   :  { %3663 = sst [smem:[#allocation34_spill]] %s3614_s0 }
   0x2   :  { %3664 = sst [smem:[#allocation35_spill]] %s3615_s1 }
   0x3   :  { %3665 = sst [smem:[#allocation36_spill]] %s3616_s2 }
   0x4   :  { %3666 = sst [smem:[#allocation37_spill]] %s3617_s3 }
   0x5   :  { %3667 = sst [smem:[#allocation38_spill]] %s3618_s4 }
   0x6   :  { %3668 = sst [smem:[#allocation39_spill]] %s3619_s5 }
   0x7   :  { %3669 = sst [smem:[#allocation40_spill]] %s3620_s6 }
   0x8   :  { %3670 = sst [smem:[#allocation41_spill]] %s3621_s7 }
   0x9   :  { %3671 = sst [smem:[#allocation42_spill]] %s3622_s8 }
   0xa   :  { %3672 = sst [smem:[#allocation43_spill]] %s3623_s9 }
   0xb   :  { %3673 = sst [smem:[#allocation44_spill]] %s3624_s10 }
   0xc   :  { %3674 = sst [smem:[#allocation45_spill]] %s3625_s11 }
   0xd   :  { %3675 = sst [smem:[#allocation46_spill]] %s3626_s12 }
   0xe   :  { %3676 = sst [smem:[#allocation47_spill]] %s3631_s17 }
   0xf   :  { %3677 = sst [smem:[#allocation48_spill]] %s3632_s18 }
  0x10   :  { %24 = vsyncpa [#allocation5], 0 }
  0x11   :  { %25 = vsyncpa [#allocation8], 0 }
  0x12   :  { %26 = vsyncpa [#allocation18], 0 }
  0x13   :  { %27 = vsyncpa [#allocation6], 0 }
  0x14   :  { %28 = vsyncpa [#allocation21], 0  ;;  %s2943_s27 = smov 0   ;;  %s2945_s28 = smov 0  }
  0x15   :  { %s2947_s29 = smov 0   ;;  %s2949_s30 = smov 0  }
  0x16 LB: > { %3678 = sst [smem:[#allocation29_spill]] %s2814_s28  ;;  %s2962_s0 = sadd.s32 4294967295, %s2822_s30   ;;  %s2822_s30 = sphi %s2949_s30, %s3734_s30   ;;  %s2818_s29 = sphi %s2947_s29, %s3737_s29   ;;  %s2814_s28 = sphi %s2945_s28, %s3736_s28   ;;  %s2810_s27 = sphi %s2943_s27, %s3735_s27  }
  0x17   : > { %3679 = sst [smem:[#allocation30_spill]] %s2818_s29  ;;  %s2965_s19 = sadd.s32 1, %s2822_s30  }
  0x18   : > { %3680 = sst [smem:[#allocation31_spill]] %s2965_s19  ;;  %s200_s1 = ssub.s32 %s2822_s30, %s2965_s19 }
  0x19   : > { %s203_s20 = sadd.s32 1, %s2818_s29  ;;  %p201_p0 = scmp.eq.s32.totalorder %s200_s1, 0 }
  0x1a   : > { %p210_p1 = scmp.ne.s32.totalorder %s2818_s29, %s2814_s28  ;;  %p211_p2 = scmp.eq.s32.totalorder %s2822_s30, 0 }
  0x1b   : > { %p216_p3 = scmp.ne.s32.totalorder %s2814_s28, %s2810_s27  ;;  %p3642_p5 = scmp.eq.s32.totalorder %s2962_s0, 0 }
  0x1c   : > { %s2975_s21 = scalar_select %p201_p0, %s2818_s29, %s203_s20  }
  0x1d   : > { %p2977_p4 = por %p211_p2, %p210_p1  ;;  %p2026_p6 = scmp.ge.s32.totalorder %s2822_s30, 1 }
  0x1e   : > { %3681 = sst [smem:[#allocation32_spill]] %s2975_s21  ;;  %p493_p7 = scmp.lt.s32.totalorder %s2822_s30, 3 }
  0x1f   : > { %p2986_p8 = por %p3642_p5, %p216_p3  ;;  %s2824_s24 = smov [#allocation4]  }
  0x20   : > { %p2991_p10 = pnand %p2026_p6, %p493_p7  ;;  %s506_s25 = sshll.u32 %s2824_s24, 4  ;;  %s507_s25 = int_to_ptr.vmem [resolvable:$true] %s506_s25 }
  0x21   : > { %s3683_s2 = scalar_select %p2986_p8, 1, 0 }
  0x22   : > { %s3685_s23 = scalar_select %p2991_p10, 1, 0 }
  0x23   : > { %3684 = sst [smem:[#allocation33_spill]] %s3683_s2  ;;  %p2260_p11 = pneg %p2991_p10 }
  0x24   : > { %p2299_p12 = scmp.lt.s32.totalorder %s2822_s30, 2  ;;  %s580_s26 = sand.u32 1, %s2822_s30  }
  0x25   : > { %p3001_p13 = pnand %p2260_p11, %p3642_p5  ;;  %s3012_s20 = sand.u32 1, %s2818_s29  }
  0x26   : > { %p3007_p0 = pnand %p2299_p12, %p2977_p4  ;;  %s3015_s24 = sshll.u32 %s3012_s20, 4 }
  0x27   : > { %s3686_s27 = scalar_select %p3001_p13, 1, 0 }
  0x28   : > { %s3687_s1 = scalar_select %p3007_p0, 1, 0 }
  0x29   : > { %s3688_s18 = sld [smem:[#allocation34_spill]]  ;;  %p3025_p2 = pneg %p3001_p13 }
  0x2b   : > { %s3689_s22 = scalar_select %p3025_p2, 1, 0 }
  0x2f   : > { %s2390_s17 = scalar_lea.hbm %s3688_s18, 128 }
  0x30   : > { %p2391_p1 = scmp.ne.s32.totalorder %s3688_s18, %s2390_s17  ;;  %p2397_p6 = scmp.lt.u32.totalorder %s2390_s17, %s3688_s18 }
  0x32   : > { %p2393_p3 = pnand %p3025_p2, %p2391_p1 }
  0x34   : > { %p2394_p4 = pneg %p2393_p3 }
  0x36   : > { %p2399_p7 = pnand %p2397_p6, %p2394_p4 }
  0x38   : > { %2402 = shalt.err (!%p2399_p7)
}
  0x39   : > { %s2403_s19 = scalar_lea.vmem %s507_s25, 128  ;;  %p2411_p5 = scmp.lt.s32.totalorder %s507_s25, %s507_s25 }
  0x3a   : > { %p2404_p11 = scmp.ne.s32.totalorder %s507_s25, %s2403_s19  ;;  %p2412_p8 = scmp.lt.s32.totalorder %s2403_s19, %s2403_s19 }
  0x3c   : > { %p2406_p12 = pnand %p2404_p11, %p3025_p2  ;;  %p2413_p10 = por %p2412_p8, %p2411_p5 }
  0x3e   : > { %p2407_p9 = pneg %p2406_p12 }
  0x40   : > { %p2414_p0 = pnand %p2413_p10, %p2407_p9 }
  0x42   : > { %2417 = shalt.err (!%p2414_p0)
}
  0x43   : > { %2263 = dma.hbm_to_vmem [thread:$0]  (!%p3001_p13), %s3688_s18, 128, %s507_s25, [#allocation5]  }
  0x44   : > { %s3042_s6 = sshll.u32 %s2822_s30, 8  ;;  %s584_s17 = scalar_lea.vmem [#allocation9], %s3015_s24 }
  0x45   : > { %s591_s29 = sshll.u32 %s584_s17, 4  ;;  %s3690_s7 = sld [smem:[#allocation41_spill]]  ;;  %s3051_s29 = int_to_ptr.vmem [resolvable:$true] %s591_s29 }
  0x46   : > { %s3053_s3 = scalar_lea.sflag [#allocation5], %s580_s26  ;;  %p3691_p8 = scmp.ne.s32.totalorder %s3687_s1, 0 }
  0x48   : > { %p3059_p9 = pneg %p3691_p8 }
  0x4a   : > { %s3692_s25 = scalar_select %p3059_p9, 1, 0 }
  0x4b   : > { %s3049_s19 = scalar_lea.hbm %s3690_s7, %s3042_s6  ;;  %s2423_s21 = scalar_lea.hbm %s3690_s7, 512 }
  0x4c   : > { %s2418_s9 = scalar_lea.hbm %s3049_s19, 256  ;;  %p2424_p1 = scmp.lt.u32.totalorder %s3049_s19, %s3690_s7 }
  0x4d   : > { %p2419_p5 = scmp.ne.s32.totalorder %s3049_s19, %s2418_s9  ;;  %p2425_p3 = scmp.lt.u32.totalorder %s2423_s21, %s2418_s9 }
  0x4e   : > { %p2427_p6 = scmp.lt.u32.totalorder %s2418_s9, %s3049_s19 }
  0x4f   : > { %p2421_p10 = pnand %p3059_p9, %p2419_p5  ;;  %p2426_p4 = por %p2425_p3, %p2424_p1 }
  0x51   : > { %p2422_p0 = pneg %p2421_p10  ;;  %p2428_p7 = por %p2427_p6, %p2426_p4 }
  0x53   : > { %p2429_p11 = pnand %p2428_p7, %p2422_p0 }
  0x55   : > { %2432 = shalt.err (!%p2429_p11)
}
  0x56   : > { %s2433_s26 = scalar_lea.vmem %s3051_s29, 256  ;;  %s2825_s4 = smov [#allocation9]  }
  0x57   : > { %p2434_p12 = scmp.ne.s32.totalorder %s3051_s29, %s2433_s26  ;;  %s2438_s17 = sshll.u32 %s2825_s4, 4  ;;  %s2439_s17 = int_to_ptr.vmem [resolvable:$false] %s2438_s17 }
  0x58   : > { %s2440_s5 = scalar_lea.vmem %s2439_s17, 512  ;;  %p2441_p13 = scmp.lt.s32.totalorder %s3051_s29, %s2439_s17 }
  0x59   : > { %p2436_p5 = pnand %p2434_p12, %p3059_p9  ;;  %p2442_p2 = scmp.lt.s32.totalorder %s2440_s5, %s2433_s26 }
  0x5b   : > { %p2437_p10 = pneg %p2436_p5  ;;  %p2443_p1 = por %p2442_p2, %p2441_p13 }
  0x5d   : > { %p2444_p3 = pnand %p2443_p1, %p2437_p10 }
  0x5f   : > { %2447 = shalt.err (!%p2444_p3)
}
  0x60   : > { %s3653_s18 = smov 64   ;;  %s3655_s9 = smov 4  }
  0x61   : > { %2276 = dma.hbm_to_vmem [thread:$0]  (!%p3691_p8), %s3049_s19, 256, %s3051_s29, %s3053_s3, %s3653_s18, %s3653_s18, %s3655_s9  }
  0x62   : > { %s3087_s21 = sshll.u32 %s2822_s30, 4  ;;  %s3693_s8 = sld [smem:[#allocation42_spill]] }
  0x63   : > { %s604_s5 = scalar_lea.vmem [#allocation10], %s3012_s20 }
  0x64   : > { %s611_s7 = sshll.u32 %s604_s5, 4  ;;  %s612_s7 = int_to_ptr.vmem [resolvable:$true] %s611_s7 }
  0x68   : > { %s3093_s17 = scalar_lea.hbm %s3693_s8, %s3087_s21  ;;  %s2453_s19 = scalar_lea.hbm %s3693_s8, 32 }
  0x69   : > { %s2448_s2 = scalar_lea.hbm %s3093_s17, 16  ;;  %p2454_p4 = scmp.lt.u32.totalorder %s3093_s17, %s3693_s8 }
  0x6a   : > { %p2449_p13 = scmp.ne.s32.totalorder %s3093_s17, %s2448_s2  ;;  %p2455_p6 = scmp.lt.u32.totalorder %s2453_s19, %s2448_s2 }
  0x6b   : > { %p2457_p11 = scmp.lt.u32.totalorder %s2448_s2, %s3093_s17 }
  0x6c   : > { %p2451_p2 = pnand %p2449_p13, %p3059_p9  ;;  %p2456_p7 = por %p2455_p6, %p2454_p4 }
  0x6e   : > { %p2452_p0 = pneg %p2451_p2  ;;  %p2458_p12 = por %p2457_p11, %p2456_p7 }
  0x70   : > { %p2459_p5 = pnand %p2458_p12, %p2452_p0 }
  0x72   : > { %2462 = shalt.err (!%p2459_p5)
}
  0x73   : > { %s2463_s4 = scalar_lea.vmem %s612_s7, 16  ;;  %s2828_s5 = smov [#allocation10]  }
  0x74   : > { %p2464_p10 = scmp.ne.s32.totalorder %s612_s7, %s2463_s4  ;;  %s2468_s9 = sshll.u32 %s2828_s5, 4  ;;  %s2469_s9 = int_to_ptr.vmem [resolvable:$false] %s2468_s9 }
  0x75   : > { %s2470_s30 = scalar_lea.vmem %s2469_s9, 32  ;;  %p2471_p13 = scmp.lt.s32.totalorder %s612_s7, %s2469_s9 }
  0x76   : > { %p2466_p1 = pnand %p2464_p10, %p3059_p9  ;;  %p2472_p2 = scmp.lt.s32.totalorder %s2470_s30, %s2463_s4 }
  0x78   : > { %p2467_p3 = pneg %p2466_p1  ;;  %p2473_p8 = por %p2472_p2, %p2471_p13 }
  0x7a   : > { %p2474_p4 = pnand %p2473_p8, %p2467_p3 }
  0x7c   : > { %2477 = shalt.err (!%p2474_p4)
}
  0x7d   : > { %p3694_p6 = scmp.ne.s32.totalorder %s3687_s1, 0  ;;  %s3695_s10 = sld [smem:[#allocation44_spill]] }
  0x7e   : > { %s630_s9 = scalar_lea.vmem [#allocation11], %s3015_s24 }
  0x7f   : > { %2279 = dma.hbm_to_vmem [thread:$0]  (!%p3694_p6), %s3093_s17, 16, %s612_s7, %s3053_s3  }
  0x80   : > { %s637_s19 = sshll.u32 %s630_s9, 4  ;;  %s3121_s19 = int_to_ptr.vmem [resolvable:$true] %s637_s19 }
  0x83   : > { %s3118_s29 = scalar_lea.hbm %s3695_s10, %s3042_s6  ;;  %s2483_s17 = scalar_lea.hbm %s3695_s10, 512 }
  0x84   : > { %s2478_s26 = scalar_lea.hbm %s3118_s29, 256  ;;  %p2484_p11 = scmp.lt.u32.totalorder %s3118_s29, %s3695_s10 }
  0x85   : > { %p2479_p8 = scmp.ne.s32.totalorder %s3118_s29, %s2478_s26  ;;  %p2485_p12 = scmp.lt.u32.totalorder %s2483_s17, %s2478_s26 }
  0x86   : > { %p2487_p10 = scmp.lt.u32.totalorder %s2478_s26, %s3118_s29 }
  0x87   : > { %p2481_p0 = pnand %p2479_p8, %p3059_p9  ;;  %p2486_p5 = por %p2485_p12, %p2484_p11 }
  0x89   : > { %p2482_p7 = pneg %p2481_p0  ;;  %p2488_p1 = por %p2487_p10, %p2486_p5 }
  0x8b   : > { %p2489_p3 = pnand %p2488_p1, %p2482_p7 }
  0x8d   : > { %2492 = shalt.err (!%p2489_p3)
}
  0x8e   : > { %s2493_s2 = scalar_lea.vmem %s3121_s19, 256  ;;  %s2829_s18 = smov [#allocation11]  }
  0x8f   : > { %p2494_p13 = scmp.ne.s32.totalorder %s3121_s19, %s2493_s2  ;;  %s2498_s9 = sshll.u32 %s2829_s18, 4  ;;  %s2499_s9 = int_to_ptr.vmem [resolvable:$false] %s2498_s9 }
  0x90   : > { %s2500_s4 = scalar_lea.vmem %s2499_s9, 512  ;;  %p2501_p8 = scmp.lt.s32.totalorder %s3121_s19, %s2499_s9 }
  0x91   : > { %p2496_p2 = pnand %p2494_p13, %p3059_p9  ;;  %p2502_p0 = scmp.lt.s32.totalorder %s2500_s4, %s2493_s2 }
  0x93   : > { %p2497_p4 = pneg %p2496_p2  ;;  %p2503_p11 = por %p2502_p0, %p2501_p8 }
  0x95   : > { %p2504_p12 = pnand %p2503_p11, %p2497_p4 }
  0x97   : > { %2507 = shalt.err (!%p2504_p12)
}
  0x98   : > { %s3696_s26 = smov 4   ;;  %s3697_s7 = smov 64  }
  0x99   : > { %2282 = dma.hbm_to_vmem [thread:$0]  (!%p3694_p6), %s3118_s29, 256, %s3121_s19, %s3053_s3, %s3697_s7, %s3697_s7, %s3696_s26  }
  0x9a   : > { %s3698_s11 = sld [smem:[#allocation45_spill]]  ;;  %s650_s2 = scalar_lea.vmem [#allocation12], %s3012_s20 }
  0x9b   : > { %s657_s18 = sshll.u32 %s650_s2, 4  ;;  %s658_s18 = int_to_ptr.vmem [resolvable:$true] %s657_s18 }
  0xa0   : > { %s3152_s30 = scalar_lea.hbm %s3698_s11, %s3087_s21  ;;  %s2513_s29 = scalar_lea.hbm %s3698_s11, 32 }
  0xa1   : > { %s2508_s9 = scalar_lea.hbm %s3152_s30, 16  ;;  %p2514_p1 = scmp.lt.u32.totalorder %s3152_s30, %s3698_s11 }
  0xa2   : > { %p2509_p7 = scmp.ne.s32.totalorder %s3152_s30, %s2508_s9  ;;  %p2515_p3 = scmp.lt.u32.totalorder %s2513_s29, %s2508_s9 }
  0xa3   : > { %p2517_p2 = scmp.lt.u32.totalorder %s2508_s9, %s3152_s30 }
  0xa4   : > { %p2511_p5 = pnand %p2509_p7, %p3059_p9  ;;  %p2516_p13 = por %p2515_p3, %p2514_p1 }
  0xa6   : > { %p2512_p10 = pneg %p2511_p5  ;;  %p2518_p4 = por %p2517_p2, %p2516_p13 }
  0xa8   : > { %p2519_p8 = pnand %p2518_p4, %p2512_p10 }
  0xaa   : > { %2522 = shalt.err (!%p2519_p8)
}
  0xab   : > { %s2523_s5 = scalar_lea.vmem %s658_s18, 16  ;;  %s2830_s2 = smov [#allocation12]  }
  0xac   : > { %p2524_p0 = scmp.ne.s32.totalorder %s658_s18, %s2523_s5  ;;  %s2528_s10 = sshll.u32 %s2830_s2, 4  ;;  %s2529_s10 = int_to_ptr.vmem [resolvable:$false] %s2528_s10 }
  0xad   : > { %s2530_s8 = scalar_lea.vmem %s2529_s10, 32  ;;  %p2531_p7 = scmp.lt.s32.totalorder %s658_s18, %s2529_s10 }
  0xae   : > { %p2526_p11 = pnand %p2524_p0, %p3059_p9  ;;  %p2532_p5 = scmp.lt.s32.totalorder %s2530_s8, %s2523_s5 }
  0xb0   : > { %p2527_p12 = pneg %p2526_p11  ;;  %p2533_p6 = por %p2532_p5, %p2531_p7 }
  0xb2   : > { %p2534_p1 = pnand %p2533_p6, %p2527_p12 }
  0xb4   : > { %2537 = shalt.err (!%p2534_p1)
}
  0xb5   : > { %p3699_p3 = scmp.ne.s32.totalorder %s3687_s1, 0  ;;  %s3700_s12 = sld [smem:[#allocation46_spill]] }
  0xb6   : > { %s668_s10 = scalar_lea.vmem [#allocation13], %s3015_s24 }
  0xb7   : > { %2285 = dma.hbm_to_vmem [thread:$0]  (!%p3699_p3), %s3152_s30, 16, %s658_s18, %s3053_s3  }
  0xb8   : > { %s675_s19 = sshll.u32 %s668_s10, 4  ;;  %s3180_s19 = int_to_ptr.vmem [resolvable:$true] %s675_s19 }
  0xbb   : > { %s3177_s29 = scalar_lea.hbm %s3700_s12, %s3042_s6  ;;  %s2543_s18 = scalar_lea.hbm %s3700_s12, 512 }
  0xbc   : > { %s2538_s17 = scalar_lea.hbm %s3177_s29, 256  ;;  %p2544_p2 = scmp.lt.u32.totalorder %s3177_s29, %s3700_s12 }
  0xbd   : > { %p2539_p6 = scmp.ne.s32.totalorder %s3177_s29, %s2538_s17  ;;  %p2545_p4 = scmp.lt.u32.totalorder %s2543_s18, %s2538_s17 }
  0xbe   : > { %p2547_p0 = scmp.lt.u32.totalorder %s2538_s17, %s3177_s29 }
  0xbf   : > { %p2541_p10 = pnand %p2539_p6, %p3059_p9  ;;  %p2546_p8 = por %p2545_p4, %p2544_p2 }
  0xc1   : > { %p2542_p13 = pneg %p2541_p10  ;;  %p2548_p11 = por %p2547_p0, %p2546_p8 }
  0xc3   : > { %p2549_p12 = pnand %p2548_p11, %p2542_p13 }
  0xc5   : > { %2552 = shalt.err (!%p2549_p12)
}
  0xc6   : > { %s2553_s9 = scalar_lea.vmem %s3180_s19, 256  ;;  %s2831_s4 = smov [#allocation13]  }
  0xc7   : > { %p2554_p7 = scmp.ne.s32.totalorder %s3180_s19, %s2553_s9  ;;  %s2558_s10 = sshll.u32 %s2831_s4, 4  ;;  %s2559_s10 = int_to_ptr.vmem [resolvable:$false] %s2558_s10 }
  0xc8   : > { %s2560_s5 = scalar_lea.vmem %s2559_s10, 512  ;;  %p2561_p6 = scmp.lt.s32.totalorder %s3180_s19, %s2559_s10 }
  0xc9   : > { %p2556_p5 = pnand %p2554_p7, %p3059_p9  ;;  %p2562_p10 = scmp.lt.s32.totalorder %s2560_s5, %s2553_s9 }
  0xcb   : > { %p2557_p1 = pneg %p2556_p5  ;;  %p2563_p2 = por %p2562_p10, %p2561_p6 }
  0xcd   : > { %p2564_p4 = pnand %p2563_p2, %p2557_p1 }
  0xcf   : > { %2567 = shalt.err (!%p2564_p4)
}
  0xd0   : > { %2288 = dma.hbm_to_vmem [thread:$0]  (!%p3699_p3), %s3177_s29, 256, %s3180_s19, %s3053_s3, %s3697_s7, %s3697_s7, %s3696_s26  }
  0xd1   : > { %s2832_s17 = smov [#allocation7]   ;;  %s3701_s8 = sld [smem:[#allocation35_spill]] }
  0xd2   : > { %s516_s30 = sshll.u32 %s2832_s17, 4  ;;  %p3702_p8 = scmp.ne.s32.totalorder %s3689_s22, 0  ;;  %s517_s30 = int_to_ptr.vmem [resolvable:$true] %s516_s30 }
  0xd7   : > { %s2568_s9 = scalar_lea.hbm %s3701_s8, 256 }
  0xd8   : > { %p2569_p13 = scmp.ne.s32.totalorder %s3701_s8, %s2568_s9  ;;  %p2575_p12 = scmp.lt.u32.totalorder %s2568_s9, %s3701_s8 }
  0xda   : > { %p2571_p0 = pnand %p2569_p13, %p3702_p8 }
  0xdc   : > { %p2572_p11 = pneg %p2571_p0 }
  0xde   : > { %p2577_p7 = pnand %p2575_p12, %p2572_p11 }
  0xe0   : > { %2580 = shalt.err (!%p2577_p7)
}
  0xe1   : > { %s2581_s29 = scalar_lea.vmem %s517_s30, 256  ;;  %p2589_p10 = scmp.lt.s32.totalorder %s517_s30, %s517_s30 }
  0xe2   : > { %p2582_p5 = scmp.ne.s32.totalorder %s517_s30, %s2581_s29  ;;  %p2590_p2 = scmp.lt.s32.totalorder %s2581_s29, %s2581_s29 }
  0xe4   : > { %p2584_p1 = pnand %p2582_p5, %p3702_p8  ;;  %p2591_p4 = por %p2590_p2, %p2589_p10 }
  0xe6   : > { %p2585_p6 = pneg %p2584_p1 }
  0xe8   : > { %p2592_p3 = pnand %p2591_p4, %p2585_p6 }
  0xea   : > { %2595 = shalt.err (!%p2592_p3)
}
  0xeb   : > { %s2833_s19 = smov 128   ;;  %s2834_s11 = smov 8  }
  0xec   : > { %p3703_p13 = scmp.ne.s32.totalorder %s3686_s27, 0  ;;  %s3229_s4 = scalar_lea.hbm %s3627_s13, %s3042_s6 }
  0xed   : > { %s689_s10 = scalar_lea.vmem [#allocation14], %s3015_s24  ;;  %s2835_s29 = smov [#allocation16]  }
  0xee   : > { %2266 = dma.hbm_to_vmem [thread:$0]  (!%p3703_p13), %s3701_s8, 256, %s517_s30, [#allocation8], %s2833_s19, %s2833_s19, %s2834_s11  }
  0xef   : > { %s696_s5 = sshll.u32 %s689_s10, 4  ;;  %s3234_s12 = sshll.u32 %s2835_s29, 4  ;;  %s3232_s5 = int_to_ptr.vmem [resolvable:$true] %s696_s5  ;;  %s537_s12 = int_to_ptr.vmem [resolvable:$true] %s3234_s12 }
  0xf0   : > { %s2596_s28 = scalar_lea.hbm %s3229_s4, 256  ;;  %s2601_s6 = scalar_lea.hbm %s3627_s13, 512 }
  0xf1   : > { %p2597_p3 = scmp.ne.s32.totalorder %s3229_s4, %s2596_s28  ;;  %p2602_p12 = scmp.lt.u32.totalorder %s3229_s4, %s3627_s13 }
  0xf2   : > { %p2603_p7 = scmp.lt.u32.totalorder %s2601_s6, %s2596_s28  ;;  %p2605_p1 = scmp.lt.u32.totalorder %s2596_s28, %s3229_s4 }
  0xf3   : > { %p2599_p0 = pnand %p2597_p3, %p3059_p9 }
  0xf4   : > { %p2604_p5 = por %p2603_p7, %p2602_p12 }
  0xf5   : > { %p2600_p11 = pneg %p2599_p0 }
  0xf6   : > { %p2606_p6 = por %p2605_p1, %p2604_p5 }
  0xf8   : > { %p2607_p10 = pnand %p2606_p6, %p2600_p11 }
  0xfa   : > { %2610 = shalt.err (!%p2607_p10)
}
  0xfb   : > { %s2611_s24 = scalar_lea.vmem %s3232_s5, 256  ;;  %s2836_s18 = smov [#allocation14]  }
  0xfc   : > { %p2612_p2 = scmp.ne.s32.totalorder %s3232_s5, %s2611_s24  ;;  %s2616_s2 = sshll.u32 %s2836_s18, 4  ;;  %s2617_s2 = int_to_ptr.vmem [resolvable:$false] %s2616_s2 }
  0xfd   : > { %s2618_s9 = scalar_lea.vmem %s2617_s2, 512  ;;  %p2619_p0 = scmp.lt.s32.totalorder %s3232_s5, %s2617_s2 }
  0xfe   : > { %p2614_p4 = pnand %p2612_p2, %p3059_p9  ;;  %p2620_p13 = scmp.lt.s32.totalorder %s2618_s9, %s2611_s24 }
 0x100   : > { %p2615_p3 = pneg %p2614_p4  ;;  %p2621_p12 = por %p2620_p13, %p2619_p0 }
 0x102   : > { %p2622_p7 = pnand %p2621_p12, %p2615_p3 }
 0x104   : > { %2625 = shalt.err (!%p2622_p7)
}
 0x105   : > { %p3704_p11 = scmp.ne.s32.totalorder %s3687_s1, 0  ;;  %s2626_s29 = scalar_lea.hbm %s3629_s15, 16 }
 0x106   : > { %p2627_p13 = scmp.ne.s32.totalorder %s3629_s15, %s2626_s29  ;;  %p2633_p6 = scmp.lt.u32.totalorder %s2626_s29, %s3629_s15 }
 0x107   : > { %2291 = dma.hbm_to_vmem [thread:$0]  (!%p3704_p11), %s3229_s4, 256, %s3232_s5, %s3053_s3, %s3697_s7, %s3697_s7, %s3696_s26  }
 0x108   : > { %p2629_p5 = pnand %p2627_p13, %p3702_p8 }
 0x10a   : > { %p2630_p1 = pneg %p2629_p5 }
 0x10c   : > { %p2635_p10 = pnand %p2633_p6, %p2630_p1 }
 0x10e   : > { %2638 = shalt.err (!%p2635_p10)
}
 0x10f   : > { %s2639_s17 = scalar_lea.vmem %s537_s12, 16  ;;  %s2646_s26 = scalar_lea.vmem %s537_s12, 32 }
 0x110   : > { %p2640_p2 = scmp.ne.s32.totalorder %s537_s12, %s2639_s17  ;;  %p2647_p0 = scmp.lt.s32.totalorder %s537_s12, %s537_s12 }
 0x111   : > { %p2648_p12 = scmp.lt.s32.totalorder %s2646_s26, %s2639_s17 }
 0x112   : > { %p2642_p4 = pnand %p2640_p2, %p3702_p8 }
 0x113   : > { %p2649_p7 = por %p2648_p12, %p2647_p0 }
 0x114   : > { %p2643_p3 = pneg %p2642_p4 }
 0x116   : > { %p2650_p11 = pnand %p2649_p7, %p2643_p3 }
 0x118   : > { %2653 = shalt.err (!%p2650_p11)
}
 0x119   : > { %p3705_p13 = scmp.ne.s32.totalorder %s3686_s27, 0  ;;  %s2837_s5 = smov [#allocation17]  }
 0x11a   : > { %s547_s24 = sshll.u32 %s2837_s5, 4  ;;  %s3284_s9 = scalar_lea.hbm %s3628_s14, %s3087_s21  ;;  %s548_s24 = int_to_ptr.vmem [resolvable:$true] %s547_s24 }
 0x11b   : > { %2269 = dma.hbm_to_vmem [thread:$0]  (!%p3705_p13), %s3629_s15, 16, %s537_s12, [#allocation8]  }
 0x11c   : > { %s2654_s29 = scalar_lea.hbm %s3630_s16, 16 }
 0x11d   : > { %p2655_p11 = scmp.ne.s32.totalorder %s3630_s16, %s2654_s29  ;;  %p2661_p6 = scmp.lt.u32.totalorder %s2654_s29, %s3630_s16 }
 0x11f   : > { %p2657_p5 = pnand %p2655_p11, %p3702_p8 }
 0x121   : > { %p2658_p1 = pneg %p2657_p5 }
 0x123   : > { %p2663_p10 = pnand %p2661_p6, %p2658_p1 }
 0x125   : > { %2666 = shalt.err (!%p2663_p10)
}
 0x126   : > { %s2667_s11 = scalar_lea.vmem %s548_s24, 16  ;;  %s2674_s21 = scalar_lea.vmem %s548_s24, 32 }
 0x127   : > { %p2668_p2 = scmp.ne.s32.totalorder %s548_s24, %s2667_s11  ;;  %p2675_p0 = scmp.lt.s32.totalorder %s548_s24, %s548_s24 }
 0x128   : > { %p2676_p12 = scmp.lt.s32.totalorder %s2674_s21, %s2667_s11 }
 0x129   : > { %p2670_p4 = pnand %p2668_p2, %p3702_p8 }
 0x12a   : > { %p2677_p7 = por %p2676_p12, %p2675_p0 }
 0x12b   : > { %p2671_p3 = pneg %p2670_p4 }
 0x12d   : > { %p2678_p9 = pnand %p2677_p7, %p2671_p3 }
 0x12f   : > { %2681 = shalt.err (!%p2678_p9)
}
 0x130   : > { %2272 = dma.hbm_to_vmem [thread:$0]  (!%p3705_p13), %s3630_s16, 16, %s548_s24, [#allocation18]  }
 0x131   : > { %s709_s22 = scalar_lea.vmem [#allocation15], %s3012_s20  ;;  %s2682_s4 = scalar_lea.hbm %s3284_s9, 16 }
 0x132   : > { %s716_s7 = sshll.u32 %s709_s22, 4  ;;  %p2683_p8 = scmp.ne.s32.totalorder %s3284_s9, %s2682_s4  ;;  %s717_s7 = int_to_ptr.vmem [resolvable:$true] %s716_s7 }
 0x133   : > { %p3706_p11 = scmp.ne.s32.totalorder %s3692_s25, 0  ;;  %s2687_s18 = scalar_lea.hbm %s3628_s14, 32 }
 0x134   : > { %p2688_p1 = scmp.lt.u32.totalorder %s3284_s9, %s3628_s14  ;;  %p2689_p6 = scmp.lt.u32.totalorder %s2687_s18, %s2682_s4 }
 0x135   : > { %p2685_p5 = pnand %p2683_p8, %p3706_p11  ;;  %p2691_p2 = scmp.lt.u32.totalorder %s2682_s4, %s3284_s9 }
 0x136   : > { %p2690_p10 = por %p2689_p6, %p2688_p1 }
 0x137   : > { %p2686_p9 = pneg %p2685_p5 }
 0x138   : > { %p2692_p13 = por %p2691_p2, %p2690_p10 }
 0x13a   : > { %p2693_p4 = pnand %p2692_p13, %p2686_p9 }
 0x13c   : > { %2696 = shalt.err (!%p2693_p4)
}
 0x13d   : > { %s2697_s20 = scalar_lea.vmem %s717_s7, 16  ;;  %s2838_s24 = smov [#allocation15]  }
 0x13e   : > { %p2698_p3 = scmp.ne.s32.totalorder %s717_s7, %s2697_s20  ;;  %s2702_s10 = sshll.u32 %s2838_s24, 4  ;;  %s2703_s10 = int_to_ptr.vmem [resolvable:$false] %s2702_s10 }
 0x13f   : > { %s2704_s29 = scalar_lea.vmem %s2703_s10, 32  ;;  %p2705_p7 = scmp.lt.s32.totalorder %s717_s7, %s2703_s10 }
 0x140   : > { %p2700_p0 = pnand %p2698_p3, %p3706_p11  ;;  %p2706_p8 = scmp.lt.s32.totalorder %s2704_s29, %s2697_s20 }
 0x142   : > { %p2701_p12 = pneg %p2700_p0  ;;  %p2707_p5 = por %p2706_p8, %p2705_p7 }
 0x144   : > { %p2708_p1 = pnand %p2707_p5, %p2701_p12 }
 0x146   : > { %2711 = shalt.err (!%p2708_p1)
}
 0x147   : > { %p3707_p6 = scmp.ne.s32.totalorder %s3687_s1, 0  ;;  %p3708_p9 = scmp.ne.s32.totalorder %s3685_s23, 0 }
 0x148   : > { %p3709_p11 = scmp.eq.s32.totalorder (!%p3708_p9), %s2962_s0, 0 }
 0x149   : > { %2294 = dma.hbm_to_vmem [thread:$0]  (!%p3707_p6), %s3284_s9, 16, %s717_s7, %s3053_s3  }
 0x14a   : > { %725 = sbr.rel (%p3708_p9) target bundleno = 2761 (0xac9), region = 88 }
 0x151   : > { %2781 = dma.done.wait (%p3709_p11), [#allocation5], 128   ;;  %p3710_p10 = pmov %p3709_p11 }
 0x153   : > { %2783 = vsyncadd (%p3710_p10), [#allocation5], 4294967168  ;;  %p3711_p2 = pmov %p3710_p10 }
 0x155   : > { %2785 = dma.done.wait (%p3711_p2), [#allocation8], 256   ;;  %p3712_p13 = pmov %p3711_p2 }
 0x156   : > { %s3713_s1 = sld [smem:[#allocation29_spill]]  ;;  %s3714_s25 = sld [smem:[#allocation33_spill]] }
 0x157   : > { %2787 = vsyncadd (%p3712_p13), [#allocation8], 4294967040  ;;  %s735_s30 = sand.u32 1, %s2962_s0  }
 0x158   : > { %s736_s9 = scalar_lea.sflag [#allocation5], %s735_s30 }
 0x15c   : > { %s3335_s3 = sand.u32 1, %s3713_s1   ;;  %p3715_p4 = scmp.ne.s32.totalorder %s3714_s25, 0 }
 0x15d   : > { %s3338_s23 = sshll.u32 %s3335_s3, 4 }
 0x15e   : > { %s739_s19 = scalar_lea.vmem [#allocation9], %s3338_s23 }
 0x15f   : > { %2789 = dma.done.wait (%p3715_p4), %s736_s9, 1072  }
 0x160   : > { %2791 = vsyncadd (%p3715_p4), %s736_s9, 4294966224  ;;  %s747_s12 = scalar_lea.vmem [#allocation10], %s3335_s3  ;;  %s756_s6 = scalar_lea.vmem [#allocation11], %s3338_s23 }
 0x161   : > { %s764_s11 = scalar_lea.vmem [#allocation12], %s3335_s3  ;;  %s773_s21 = scalar_lea.vmem [#allocation13], %s3338_s23 }
 0x162   : > { %p3716_p3 = pmov %p3711_p2 }
 0x163   : > { %p3717_p0 = pmov %p3711_p2 }
 0x164   : > { %2793 = dma.done.wait (%p3716_p3), [#allocation8], 16  }
 0x165   : > { %2795 = vsyncadd (%p3717_p0), [#allocation8], 4294967280  ;;  %p3718_p12 = pmov %p3717_p0 }
 0x166   : > { %p3719_p7 = pmov %p3717_p0 }
 0x167   : > { %2797 = dma.done.wait (%p3718_p12), [#allocation18], 16  }
 0x168   : > { %2799 = vsyncadd (%p3719_p7), [#allocation18], 4294967280  ;;  %p891_p8 = scmp.lt.s32.totalorder %s2962_s0, 1  ;;  %s3720_s27 = sld [smem:[#allocation39_spill]] }
 0x169   : > { %s3721_s20 = sld [smem:[#allocation38_spill]]  ;;  %s3722_s1 = sld [smem:[#allocation40_spill]] }
 0x16a   : > { %s3361_s22 = scalar_select %p891_p8, %s2962_s0, 1 }
 0x16b   : > { %s3723_s26 = sld [smem:[#allocation43_spill]]  ;;  %p3724_p5 = scmp.ne.s32.totalorder %s2962_s0, 0 }
 0x16c   : > { %s2110_s7 = sshll.u32 %s3361_s22, 4  ;;  %v914_v0 = vld [vmem:[#allocation4] sm:$0xff] (!%p3724_p5)  ;;  %vm915_vm0 = vcmask (!%p3724_p5), 261120   ;;  %v917_v1 = vld [vmem:[#allocation7] sm:$0xff] (!%p3724_p5)  ;;  %v918_v2 = vld [vmem:[#allocation7 + $0x8] sm:$0xff] (!%p3724_p5) }
 0x16d   : > { %913 = sbr.rel (%p3724_p5) target bundleno = 372 (0x174), region = 136  ;;  %916 = vst.msk [vmem:[#allocation2] sm:$0xff] (!%p3724_p5), %vm915_vm0, %v914_v0  ;;  %919 = vst.msk [vmem:[#allocation3] sm:$0xff] (!%p3724_p5), %vm915_vm0, %v917_v1 }
 0x16e   : > { %s898_s18 = scalar_lea.vmem %s3720_s27, %s3361_s22  ;;  %920 = vst.msk [vmem:[#allocation3 + $0x8] sm:$0xff] (!%p3724_p5), %vm915_vm0, %v918_v2 }
 0x16f   : > { %s3371_s24 = scalar_lea.vmem %s3721_s20, %s2110_s7  ;;  %s3376_s25 = scalar_lea.vmem %s3722_s1, %s2110_s7 }
 0x171   : > { %s3381_s17 = scalar_lea.vmem %s3723_s26, %s2110_s7 }
 0x174 PF: > { %s3725_s27 = sld [smem:[#allocation36_spill]]  ;;  %v2839_v4 = vmov 0   ;;  %v2840_v5 = vmov 0.0   ;;  %v921_v7 = vld [vmem:[#allocation2] sm:$0xff]  ;;  %vm979_vm1 = vcmask 1043456   ;;  %vm2841_vm2 = vmmov 0  }
 0x175   : > { %2357 = vset.pattern.permute.xlu0 %v2839_v4  ;;  %2142 = vmatprep.subr.bf16.mxu0 %v2840_v5  ;;  %v3393_v8 = vpack.c.bf16 %v921_v7, %v921_v7  ;;  %v2364_v9 = vld [vmem:[%s3371_s24] sm:$0xff]   ;;  %v2365_v11 = vld [vmem:[%s3371_s24 + $0x8] sm:$0xff]   ;;  %s3727_s10 = sld [smem:[#allocation37_spill]]  ;;  %vm1051_vm3 = vcmask 261120   ;;  %v930_v14 = vlaneseq  ;;  %vm975_vm6 = vcmask 64512   ;;  %v3460_v35 = vld [vmem:[#allocation3 + $0x8] sm:$0xff] }
 0x176   : > { %2148 = vmatprep.subr.bf16.mxu1 %v2840_v5  ;;  %2358 = vset.pattern.permute.xlu1 %v2839_v4  ;;  %v2366_v20 = vld [vmem:[%s739_s19] sm:$0xff]   ;;  %v2368_v23 = vld [vmem:[%s739_s19 + $0x8] sm:$0xff]   ;;  %s2842_s19 = smov 96   ;;  %vm1325_vm9 = vcmask 130048   ;;  %p2304_p1 = scmp.eq.s32.totalorder %s2962_s0, 1 }
 0x177   : > { %v981_v10 = vsel %vm979_vm1, %v3393_v8, 0  ;;  %2149 = vmatpush3.bf16.msra.mxu1 %v2364_v9  ;;  %2144 = vmatprep.mubr.msk.bf16.mxu0 %vm2841_vm2, %v2840_v5  ;;  %v3422_v15 = vand.u32 127, %v930_v14  ;;  %v2367_v22 = vld [vmem:[%s3376_s25] sm:$0xff]   ;;  %v2369_v24 = vld [vmem:[%s3376_s25 + $0x8] sm:$0xff]  }
 0x178   : > { %2143 = vmatpush3.bf16.msra.mxu0 %v981_v10  ;;  %2150 = vmatprep.subr.bf16.mxu1 %v2840_v5  ;;  %v2070_v29 = vld [vmem:[%s898_s18] ss:$0 sm:$0xff]  ;;  %v3458_v33 = vld [vmem:[#allocation3] sm:$0xff] }
 0x179   : > { %2156 = vmatprep.subr.bf16.mxu0 %v2840_v5  ;;  %2152 = vmatprep.mubr.msk.bf16.mxu1 %vm2841_vm2, %v2840_v5  ;;  %v2080_v52 = vld [vmem:[%s747_s12] ss:$0 sm:$0xff]  ;;  %s2843_s12 = smov 32  }
 0x17a   : > { %s3726_s2 = smov %s3725_s27  ;;  %v926_v3 = vld [vmem:[%s3725_s27] sm:$0xff] }
 0x17b   : > { %933 = vperm.xlu0 %2357, %v926_v3   ;;  %v927_v6 = vld [vmem:[%s3726_s2 + $0x8] sm:$0xff]  ;;  %v3408_v12 = vld [vmem:[%s3727_s10] sm:$0xff]  ;;  %2151 = vmatpush3.bf16.msra.mxu1 %v2365_v11 }
 0x17c   : > { %946 = vperm.xlu1 %2358, %v3408_v12   ;;  %v3414_v13 = vld [vmem:[%s3727_s10 + $0x8] sm:$0xff]  ;;  %2164 = vmatprep.subr.bf16.mxu1 %v2840_v5 }
 0x17e   : > { %2153 = vmatmul.mubr.msk.bf16.vlgmr.msra.gmra.mrb[0].mxu1 %vm1051_vm3, %v3393_v8 }
 0x17f   : > { %936 = vperm.xlu0 %2357, %v927_v6   ;;  %2168 = vmatprep.mubr.msk.bf16.mxu1 %vm2841_vm2, %v2840_v5 }
 0x180   : > { %949 = vperm.xlu1 %2358, %v3414_v13   ;;  %2165 = vmatpush3.bf16.msra.mxu1 %v2367_v22 }
 0x181   : > { %2166 = vmatprep.subr.bf16.mxu1 %v2840_v5 }
 0x184   : > { %2167 = vmatpush3.bf16.msra.mxu1 %v2369_v24 }
 0x185   : > { %2178 = vmatprep.subr.bf16.mxu1 %v2840_v5 }
 0x1fa   : > { %v3424_v16 = vpop.permute.xlu0 %933 }
 0x1fb   : > { %vm938_vm4 = vcmp.eq.s32.totalorder %v3422_v15, %v3424_v16  ;;  %v947_v30 = vpop.permute.xlu1 %946 }
 0x1fc   : > { %v2063_v18 = vsel %vm938_vm4, 1.0, %v2840_v5  ;;  %vm951_vm7 = vcmp.eq.s32.totalorder %v3422_v15, %v947_v30 }
 0x1fd   : > { %v2065_v45 = vsel %vm951_vm7, 1.0, %v2840_v5 }
 0x1fe   : > { %v3428_v17 = vpop.permute.xlu0 %936 }
 0x1ff   : > { %vm939_vm5 = vcmp.eq.s32.totalorder %v3422_v15, %v3428_v17  ;;  %v950_v36 = vpop.permute.xlu1 %949 }
 0x200   : > { %v2064_v19 = vsel %vm939_vm5, 1.0, %v2840_v5  ;;  %vm952_vm8 = vcmp.eq.s32.totalorder %v3422_v15, %v950_v36 }
 0x201   : > { %v944_v21 = vpack.c.bf16 %v2064_v19, %v2063_v18  ;;  %v2066_v46 = vsel %vm952_vm8, 1.0, %v2840_v5 }
 0x202   : > { %v957_v47 = vpack.c.bf16 %v2066_v46, %v2065_v45  ;;  %v2370_v45 = vld [vmem:[%s756_s6] sm:$0xff]  }
 0x203   : > { %2145 = vmatmul.mubr.msk.bf16.vlgmr.msra.gmra.mrb[0].mxu0 %vm975_vm6, %v944_v21  ;;  %v2371_v46 = vld [vmem:[%s3381_s17] sm:$0xff]  }
 0x204   : > { %2157 = vmatpush3.bf16.msra.mxu0 %v2366_v20  ;;  %2160 = vmatprep.mubr.msk.bf16.mxu0 %vm2841_vm2, %v2840_v5 }
 0x205   : > { %2158 = vmatprep.subr.bf16.mxu0 %v2840_v5 }
 0x208   : > { %2159 = vmatpush3.bf16.msra.mxu0 %v2368_v23 }
 0x209   : > { %2172 = vmatprep.subr.bf16.mxu0 %v2840_v5 }
 0x251   : > { %v1088_v25 = vpop.f32.mrb[0].mxu1 }
 0x252   : > { %v2154_v26 = vpop.f32.mrb[1].mxu1  ;;  %v1089_v31 = vadd.f32 %v2070_v29, %v1088_v25 }
 0x253   : > { %v1091_v27 = vpop.f32.mrb[2].mxu1 }
 0x254   : > { %v2155_v28 = vpop.f32.mrb[3].mxu1  ;;  %v1223_v32 = vpack.c.bf16 %v1089_v31, %v1089_v31 }
 0x256   : > { %v1228_v39 = vsel %vm979_vm1, %v1223_v32, 0 }
 0x2d6   : > { %v1017_v34 = vpop.f32.mrb[0].mxu0 }
 0x2d7   : > { %v2146_v37 = vpop.f32.mrb[1].mxu0  ;;  %v1024_v40 = vmul.f32 %v1017_v34, %v3458_v33 }
 0x2d8   : > { %v1020_v38 = vpop.f32.mrb[2].mxu0 }
 0x2d9   : > { %v1025_v41 = vmul.f32 %v1020_v38, %v3460_v35  ;;  %v1027_v42 = vpack.c.bf16 %v1020_v38, %v1017_v34  ;;  %v2147_v43 = vpop.f32.mrb[3].mxu0 }
 0x2db   : > { %v1026_v44 = vpack.c.bf16 %v1025_v41, %v1024_v40  ;;  %2161 = vmatmul.mubr.msk.bf16.vlgmr.msra.gmra.mrb[4].mxu0 %vm1051_vm3, %v1027_v42 }
 0x2dc   : > { %2173 = vmatpush3.bf16.msra.mxu0 %v1228_v39  ;;  %2174 = vmatprep.mubr.msk.bf16.mxu0 %vm2841_vm2, %v2840_v5 }
 0x2dd   : > { %2169 = vmatmul.mubr.msk.bf16.vlgmr.msra.gmra.mrb[4].mxu1 %vm1051_vm3, %v1026_v44  ;;  %2184 = vmatprep.subr.bf16.mxu0 %v2840_v5 }
 0x2de   : > { %2180 = vmatprep.mubr.msk.bf16.mxu1 %vm2841_vm2, %v2840_v5 }
 0x2e3   : > { %2175 = vmatmul.mubr.msk.bf16.vlgmr.msra.gmra.mrb[8].mxu0 %vm975_vm6, %v957_v47 }
 0x2e4   : > { %2188 = vmatprep.mubr.msk.bf16.mxu0 %vm2841_vm2, %v2840_v5  ;;  %2185 = vmatpush3.bf16.msra.mxu0 %v2370_v45 }
 0x2e5   : > { %2186 = vmatprep.subr.bf16.mxu0 %v2840_v5 }
 0x3ae   : > { %v1151_v48 = vpop.f32.mrb[4].mxu0 }
 0x3af   : > { %v2162_v49 = vpop.f32.mrb[5].mxu0 }
 0x3b0   : > { %v1154_v50 = vpop.f32.mrb[6].mxu0  ;;  %v1207_v51 = vpop.f32.mrb[4].mxu1 }
 0x3b1   : > { %v1208_v53 = vadd.f32 %v1207_v51, %v1151_v48  ;;  %v2163_v54 = vpop.f32.mrb[7].mxu0  ;;  %v2170_v55 = vpop.f32.mrb[5].mxu1  ;;  %v2373_v48 = vld [vmem:[%s3381_s17 + $0x8] sm:$0xff]  }
 0x3b2   : > { %v1210_v56 = vpop.f32.mrb[6].mxu1 }
 0x3b3   : > { %v1221_v57 = vadd.f32 %v2080_v52, %v1208_v53  ;;  %v1211_v58 = vadd.f32 %v1210_v56, %v1154_v50  ;;  %v2171_v59 = vpop.f32.mrb[7].mxu1  ;;  %v959_v53 = vadd.s32 8, %v3414_v13 }
 0x3b4   : > { %v2089_v59 = vld [vmem:[%s764_s11] ss:$0 sm:$0xff] }
 0x3b5   : > { %v1222_v60 = vadd.f32 %v2080_v52, %v1211_v58  ;;  %1290 = vrot.lane.b32.xlu0 %v1221_v57, %s2842_s19  ;;  %v958_v52 = vadd.s32 8, %v3408_v12  ;;  %v2374_v58 = vld [vmem:[%s773_s21] sm:$0xff]   ;;  %v2375_v12 = vld [vmem:[%s773_s21 + $0x8] sm:$0xff]  }
 0x3b6   : > { %v1264_v61 = vpop.f32.mrb[8].mxu0 }
 0x3b7   : > { %v1271_v62 = vmul.f32 %v1264_v61, %v1221_v57  ;;  %1292 = vrot.lane.b32.xlu1 %v1222_v60, %s2842_s19  ;;  %v2176_v63 = vpop.f32.mrb[9].mxu0 }
 0x3b8   : > { %v1267_v0 = vpop.f32.mrb[10].mxu0 }
 0x3b9   : > { %v1272_v1 = vmul.f32 %v1267_v0, %v1222_v60  ;;  %v2177_v2 = vpop.f32.mrb[11].mxu0  ;;  %v1273_v3 = vsel %vm1051_vm3, %v1271_v62, -inf }
 0x3bb   : > { %v1274_v4 = vsel %vm1051_vm3, %v1272_v1, -inf }
 0x3bc   : > { %v1275_v6 = vmax.f32 %v1273_v3, %v1274_v4  ;;  %v925_v4 = vpack.c.bf16 %v3460_v35, %v3458_v33 }
 0x3be   : > { %v1276_v7 = vrot.slane %v1275_v6, 4 }
 0x3c0   : > { %v1277_v9 = vmax.f32 %v1275_v6, %v1276_v7 }
 0x3c2   : > { %v1278_v10 = vrot.slane %v1277_v9, 2 }
 0x3c4   : > { %v1279_v11 = vmax.f32 %v1277_v9, %v1278_v10 }
 0x3c6   : > { %v1280_v14 = vrot.slane %v1279_v11, 1 }
 0x3c8   : > { %v1281_v18 = vmax.f32 %v1279_v11, %v1280_v14 }
 0x3ca   : > { %v1282_v19 = vsub.f32 %v1271_v62, %v1281_v18  ;;  %v1283_v20 = vsub.f32 %v1272_v1, %v1281_v18 }
 0x3cc   : > { %v1284_v21 = vmul.f32 1.442695, %v1282_v19  ;;  %v1286_v22 = vmul.f32 1.442695, %v1283_v20 }
 0x3ce   : > { %2378 = vpow2.f32 %v1284_v21 }
 0x3cf   : > { %2380 = vpow2.f32 %v1286_v22 }
 0x3d8   : > { %v2379_v24 = vpop.eup %2378 }
 0x3d9   : > { %v2381_v25 = vpop.eup %2380 }
 0x3da   : > { %1309 = vxpose.xlu1.c.b16.start.end [1/1] (short) (narrow) %v957_v47, 16  ;;  %v2372_v47 = vld [vmem:[%s756_s6 + $0x8] sm:$0xff]   ;;  %s3729_s6 = scalar_lea.vmem [#allocation14], %s3338_s23  ;;  %s3731_s23 = scalar_lea.vmem [#allocation15], %s3335_s3 }
 0x3db   : > { %2187 = vmatpush3.bf16.msra.mxu0 %v2372_v47  ;;  %v2376_v2 = vld [vmem:[%s3729_s6] sm:$0xff]   ;;  %s3730_s21 = smov %s3729_s6  ;;  %s2844_s3 = smov [#allocation19]  }
 0x3dc   : > { %2200 = vmatprep.subr.bf16.mxu0 %v2840_v5  ;;  %v2377_v3 = vld [vmem:[%s3730_s21 + $0x8] sm:$0xff]   ;;  %s1757_s11 = sshll.u32 %s2844_s3, 4  ;;  %s1758_s11 = int_to_ptr.vmem [resolvable:$true] %s1757_s11 }
 0x3dd   : > { %s2712_s17 = scalar_lea.vmem %s1758_s11, 128  ;;  %p2719_p10 = scmp.lt.s32.totalorder %s1758_s11, %s1758_s11 }
 0x3de   : > { %2189 = vmatmul.mubr.msk.bf16.vlgmr.msra.gmra.mrb[12].mxu0 %vm1051_vm3, %v3393_v8  ;;  %p2713_p6 = scmp.ne.s32.totalorder %s1758_s11, %s2712_s17  ;;  %p2720_p2 = scmp.lt.s32.totalorder %s2712_s17, %s2712_s17 }
 0x3df   : > { %2204 = vmatprep.mubr.msk.bf16.mxu0 %vm2841_vm2, %v2840_v5  ;;  %2201 = vmatpush3.bf16.msra.mxu0 %v2374_v58  ;;  %v2099_v58 = vld [vmem:[#allocation17] ss:$0 sm:$0xff] }
 0x3e0   : > { %2202 = vmatprep.subr.bf16.mxu0 %v2840_v5  ;;  %p2714_p9 = pnand %p2713_p6, %p2304_p1  ;;  %p2721_p13 = por %p2720_p2, %p2719_p10 }
 0x3e2   : > { %p2715_p11 = pneg %p2714_p9 }
 0x3e3   : > { %2203 = vmatpush3.bf16.msra.mxu0 %v2375_v12 }
 0x3e4   : > { %2216 = vmatprep.subr.bf16.mxu0 %v2840_v5  ;;  %p2722_p4 = pnand %p2721_p13, %p2715_p11 }
 0x427   : > { %v1291_v23 = vpop.permute.xlu0 %1290 }
 0x428   : > { %v1296_v27 = vmul.f32 %v2379_v24, %v1291_v23 }
 0x429   : > { %v1293_v26 = vpop.permute.xlu1 %1292 }
 0x42a   : > { %v1297_v28 = vmul.f32 %v2381_v25, %v1293_v26 }
 0x42c   : > { %v2359_v29 = vpack.i.bf16 %v1297_v28, %v1296_v27  ;;  %v2097_v28 = vld [vmem:[%s3731_s23] ss:$0 sm:$0xff] }
 0x42e   : > { %2360 = vrot.lane.b32.xlu0 %v2359_v29, %s2843_s12 }
 0x440   : > { %v1317_v38 = vpop.trf.xlu1 }
 0x4a0   : > { %v2361_v30 = vpop.permute.xlu0 %2360 }
 0x4a1   : > { %v2363_v31 = vunpack.i.h.bf16 %v2361_v30  ;;  %v2362_v32 = vunpack.i.l.bf16 %v2361_v30 }
 0x4a3   : > { %v1307_v34 = vsel %vm1051_vm3, %v2381_v25, %v2363_v31  ;;  %v1306_v36 = vsel %vm1051_vm3, %v2379_v24, %v2362_v32 }
 0x4a4   : > { %v1308_v37 = vpack.c.bf16 %v1307_v34, %v1306_v36 }
 0x4a6   : > { %2179 = vmatpush3.bf16.msra.mxu1 %v1308_v37 }
 0x4a7   : > { %2192 = vmatprep.subr.bf16.mxu1 %v2840_v5 }
 0x4a9   : > { %2181 = vmatmul.mubr.msk.bf16.vlgmr.msra.gmra.mrb[8].mxu1 %vm1325_vm9, %v1317_v38 }
 0x4aa   : > { %2196 = vmatprep.mubr.msk.bf16.mxu1 %vm2841_vm2, %v2840_v5  ;;  %2193 = vmatpush3.bf16.msra.mxu1 %v2371_v46 }
 0x4ab   : > { %2194 = vmatprep.subr.bf16.mxu1 %v2840_v5 }
 0x4ae   : > { %2195 = vmatpush3.bf16.msra.mxu1 %v2373_v48 }
 0x4af   : > { %2208 = vmatprep.subr.bf16.mxu1 %v2840_v5 }
 0x4b1   : > { %v1431_v54 = vpop.f32.mrb[12].mxu0 }
 0x4b2   : > { %v2190_v55 = vpop.f32.mrb[13].mxu0 }
 0x4b3   : > { %v1434_v8 = vpop.f32.mrb[14].mxu0 }
 0x4b4   : > { %v2191_v56 = vpop.f32.mrb[15].mxu0 }
 0x4b5   : > { %v2098_v56 = vld [vmem:[#allocation16] ss:$0 sm:$0xff] }
 0x57c   : > { %v1363_v39 = vpop.f32.mrb[8].mxu1 }
 0x57d   : > { %v1369_v40 = vmax.f32 %v1363_v39, 1e-12  ;;  %v2182_v41 = vpop.f32.mrb[9].mxu1 }
 0x57e   : > { %v1366_v42 = vpop.f32.mrb[10].mxu1 }
 0x57f   : > { %2382 = vrcp.f32 %v1369_v40  ;;  %v2183_v43 = vpop.f32.mrb[11].mxu1 }
 0x589   : > { %v2383_v44 = vpop.eup %2382 }
 0x58a   : > { %1372 = vrot.lane.b32.xlu0 %v2383_v44, %s2843_s12 }
 0x5fc   : > { %v1373_v49 = vpop.permute.xlu0 %1372 }
 0x5fd   : > { %v1375_v50 = vmul.f32 %v1373_v49, %v1363_v39 }
 0x5ff   : > { %v1376_v51 = vpack.c.bf16 %v1375_v50, %v1375_v50 }
 0x601   : > { %1438 = vrot.lane.b32.xlu0 %v1376_v51, %s2842_s19 }
 0x605   : > { %961 = vperm.xlu0 %2357, %v958_v52  }
 0x609   : > { %964 = vperm.xlu0 %2357, %v959_v53  }
 0x673   : > { %v1439_v57 = vpop.permute.xlu0 %1438 }
 0x674   : > { %2197 = vmatmul.mubr.msk.bf16.vlgmr.msra.gmra.mrb[12].mxu1 %vm1051_vm3, %v1439_v57 }
 0x675   : > { %2212 = vmatprep.mubr.msk.bf16.mxu1 %vm2841_vm2, %v2840_v5  ;;  %2209 = vmatpush3.bf16.msra.mxu1 %v2376_v2 }
 0x676   : > { %2210 = vmatprep.subr.bf16.mxu1 %v2840_v5 }
 0x679   : > { %2211 = vmatpush3.bf16.msra.mxu1 %v2377_v3 }
 0x67c   : > { %2213 = vmatmul.mubr.msk.bf16.vlgmr.msra.gmra.mrb[16].mxu1 %vm1051_vm3, %v925_v4 }
 0x684   : > { %v962_v18 = vpop.permute.xlu0 %961 }
 0x685   : > { %vm966_vm11 = vcmp.eq.s32.totalorder %v3422_v15, %v962_v18 }
 0x686   : > { %vm968_vm13 = vmor %vm938_vm4, %vm966_vm11 }
 0x687   : > { %v2067_v21 = vsel %vm968_vm13, 1.0, %v2840_v5 }
 0x688   : > { %v965_v19 = vpop.permute.xlu0 %964 }
 0x689   : > { %vm967_vm10 = vcmp.eq.s32.totalorder %v3422_v15, %v965_v19 }
 0x68a   : > { %vm969_vm12 = vmor %vm939_vm5, %vm967_vm10 }
 0x68b   : > { %v2068_v35 = vsel %vm969_vm12, 1.0, %v2840_v5 }
 0x68c   : > { %v974_v22 = vpack.c.bf16 %v2068_v35, %v2067_v21 }
 0x747   : > { %v1489_v13 = vpop.f32.mrb[12].mxu1 }
 0x748   : > { %v1490_v60 = vadd.f32 %v1489_v13, %v1431_v54  ;;  %v2198_v61 = vpop.f32.mrb[13].mxu1 }
 0x749   : > { %v1492_v62 = vpop.f32.mrb[14].mxu1 }
 0x74a   : > { %v1502_v63 = vadd.f32 %v2089_v59, %v1490_v60  ;;  %v2199_v0 = vpop.f32.mrb[15].mxu1 }
 0x74c   : > { %v1503_v1 = vpack.c.bf16 %v1502_v63, %v1502_v63  ;;  %v1683_v11 = vmax.f32 %v1502_v63, 0.0 }
 0x74e   : > { %2205 = vmatmul.mubr.msk.bf16.vlgmr.msra.gmra.mrb[16].mxu0 %vm1051_vm3, %v1503_v1  ;;  %v1684_v14 = vsel %vm1051_vm3, %v1683_v11, 0.0 }
 0x74f   : > { %2218 = vmatprep.mubr.msk.bf16.mxu0 %vm2841_vm2, %v2840_v5  ;;  %v1621_v23 = vpop.f32.mrb[16].mxu1 }
 0x750   : > { %v2214_v24 = vpop.f32.mrb[17].mxu1 }
 0x751   : > { %v1624_v25 = vpop.f32.mrb[18].mxu1 }
 0x752   : > { %v2215_v17 = vpop.f32.mrb[19].mxu1 }
 0x821   : > { %v1557_v6 = vpop.f32.mrb[16].mxu0 }
 0x822   : > { %1564 = vrot.lane.b32.xlu0 %v1557_v6, %s2842_s19  ;;  %v2206_v7 = vpop.f32.mrb[17].mxu0 }
 0x823   : > { %v1560_v9 = vpop.f32.mrb[18].mxu0 }
 0x824   : > { %v2207_v10 = vpop.f32.mrb[19].mxu0 }
 0x841   : > { %1685 = vadd.xlane.f32.xlu0 %v1684_v14 }
 0x894   : > { %v1565_v33 = vpop.permute.xlu0 %1564 }
 0x895   : > { %v1567_v20 = vpack.c.bf16 %v1565_v33, %v1557_v6 }
 0x897   : > { %2217 = vmatpush3.bf16.msra.mxu0 %v1567_v20 }
 0x89a   : > { %2219 = vmatmul.mubr.msk.bf16.vlgmr.msra.gmra.mrb[20].mxu0 %vm1325_vm9, %v974_v22 }
 0x8ce   : > { %v1686_v26 = vpop.xlane.xlu0 %1685 }
 0x8cf   : > { %v1688_v30 = vmul.f32 0.03125, %v1686_v26 }
 0x8d1   : > { %v1689_v37 = vsub.f32 %v1683_v11, %v1688_v30 }
 0x8d3   : > { %v1690_v41 = vmul.f32 %v1689_v37, %v1689_v37 }
 0x8d5   : > { %v1691_v42 = vsel %vm1051_vm3, %v1690_v41, 0.0 }
 0x96d   : > { %v1665_v27 = vpop.f32.mrb[20].mxu0 }
 0x96e   : > { %v1666_v15 = vadd.f32 %v1665_v27, %v1621_v23  ;;  %v2220_v16 = vpop.f32.mrb[21].mxu0 }
 0x96f   : > { %v1668_v29 = vpop.f32.mrb[22].mxu0 }
 0x970   : > { %v1679_v31 = vadd.f32 %v2097_v28, %v1666_v15  ;;  %v1669_v32 = vadd.f32 %v1668_v29, %v1624_v25  ;;  %v2221_v34 = vpop.f32.mrb[23].mxu0 }
 0x972   : > { %v1680_v5 = vadd.f32 %v2097_v28, %v1669_v32  ;;  %v1712_v36 = vmax.f32 %v1679_v31, 0.0 }
 0x974   : > { %v1714_v38 = vsel %vm1051_vm3, %v1712_v36, 0.0  ;;  %v1713_v39 = vmax.f32 %v1680_v5, 0.0 }
 0x975   : > { %1715 = vadd.xlane.f32.xlu1 %v1714_v38 }
 0x976   : > { %v1717_v40 = vsel %vm1051_vm3, %v1713_v39, 0.0 }
 0x979   : > { %1718 = vadd.xlane.f32.xlu1 %v1717_v40 }
 0x97d   : > { %1692 = vadd.xlane.f32.xlu1 %v1691_v42 }
 0xa02   : > { %v1716_v43 = vpop.xlane.xlu1 %1715 }
 0xa03   : > { %v1720_v44 = vmul.f32 0.03125, %v1716_v43 }
 0xa05   : > { %v1722_v45 = vsub.f32 %v1712_v36, %v1720_v44 }
 0xa06   : > { %v1719_v46 = vpop.xlane.xlu1 %1718 }
 0xa07   : > { %v1721_v47 = vmul.f32 0.03125, %v1719_v46  ;;  %v1724_v48 = vmul.f32 %v1722_v45, %v1722_v45 }
 0xa09   : > { %v1723_v49 = vsub.f32 %v1713_v39, %v1721_v47  ;;  %v1726_v50 = vsel %vm1051_vm3, %v1724_v48, 0.0 }
 0xa0a   : > { %1727 = vadd.xlane.f32.xlu0 %v1726_v50  ;;  %v1693_v51 = vpop.xlane.xlu1 %1692 }
 0xa0b   : > { %v1694_v52 = vmul.f32 0.03125, %v1693_v51  ;;  %v1725_v53 = vmul.f32 %v1723_v49, %v1723_v49 }
 0xa0d   : > { %v1695_v54 = vadd.f32 1e-05, %v1694_v52  ;;  %v1729_v55 = vsel %vm1051_vm3, %v1725_v53, 0.0 }
 0xa0e   : > { %1730 = vadd.xlane.f32.xlu1 %v1729_v55 }
 0xa0f   : > { %2384 = vrsqrt.f32 %v1695_v54 }
 0xa19   : > { %v2385_v8 = vpop.eup %2384 }
 0xa1a   : > { %v1697_v57 = vmul.f32 %v2385_v8, %v1689_v37 }
 0xa1c   : > { %v1704_v12 = vmul.f32 %v2098_v56, %v1697_v57 }
 0xa1e   : > { %v1711_v13 = vadd.f32 %v2099_v58, %v1704_v12 }
 0xa20   : > { %1744 = vst.msk [vmem:[#allocation19] sm:$0xff] %vm1051_vm3, %v1711_v13  ;;  %1747 = vst.msk [vmem:[#allocation2] sm:$0xff] %vm1051_vm3, %v1711_v13 }
 0xa21   : > { %2725 = shalt.err (!%p2722_p4)
}
 0xa22   : > { %s3732_s25 = sld [smem:[#allocation47_spill]] }
 0xa28   : > { %s2726_s4 = scalar_lea.hbm %s3732_s25, 128 }
 0xa29   : > { %p2727_p3 = scmp.ne.s32.totalorder %s3732_s25, %s2726_s4  ;;  %p2732_p7 = scmp.lt.u32.totalorder %s2726_s4, %s3732_s25 }
 0xa2b   : > { %p2728_p0 = pnand %p2727_p3, %p2304_p1 }
 0xa2d   : > { %p2729_p12 = pneg %p2728_p0 }
 0xa2f   : > { %p2734_p8 = pnand %p2732_p7, %p2729_p12 }
 0xa31   : > { %2737 = shalt.err (!%p2734_p8)
}
 0xa32   : > { %2253 = dma.vmem_to_hbm [thread:$0]  (%p2304_p1), %s1758_s11, 128, %s3732_s25, [#allocation6]  }
 0xa33   : > { %s2845_s29 = smov [#allocation20]  }
 0xa34   : > { %s1767_s1 = sshll.u32 %s2845_s29, 4  ;;  %s1768_s1 = int_to_ptr.vmem [resolvable:$true] %s1767_s1 }
 0xa35   : > { %s2738_s24 = scalar_lea.vmem %s1768_s1, 256  ;;  %p2745_p11 = scmp.lt.s32.totalorder %s1768_s1, %s1768_s1 }
 0xa36   : > { %p2739_p5 = scmp.ne.s32.totalorder %s1768_s1, %s2738_s24  ;;  %p2746_p10 = scmp.lt.s32.totalorder %s2738_s24, %s2738_s24 }
 0xa38   : > { %p2740_p6 = pnand %p2739_p5, %p2304_p1  ;;  %p2747_p2 = por %p2746_p10, %p2745_p11 }
 0xa3a   : > { %p2741_p9 = pneg %p2740_p6 }
 0xa3c   : > { %p2748_p13 = pnand %p2747_p2, %p2741_p9 }
 0xa97   : > { %v1728_v59 = vpop.xlane.xlu0 %1727 }
 0xa98   : > { %v1732_v60 = vmul.f32 0.03125, %v1728_v59 }
 0xa9a   : > { %v1734_v61 = vadd.f32 1e-05, %v1732_v60 }
 0xa9b   : > { %v1731_v62 = vpop.xlane.xlu1 %1730 }
 0xa9c   : > { %2386 = vrsqrt.f32 %v1734_v61  ;;  %v1733_v63 = vmul.f32 0.03125, %v1731_v62 }
 0xa9e   : > { %v1735_v0 = vadd.f32 1e-05, %v1733_v63 }
 0xaa0   : > { %2388 = vrsqrt.f32 %v1735_v0 }
 0xaa6   : > { %v2387_v1 = vpop.eup %2386 }
 0xaa7   : > { %v1738_v2 = vmul.f32 %v2387_v1, %v1722_v45 }
 0xaa9   : > { %v1740_v3 = vmul.f32 %v2098_v56, %v1738_v2 }
 0xaaa   : > { %v2389_v4 = vpop.eup %2388 }
 0xaab   : > { %v1739_v6 = vmul.f32 %v2389_v4, %v1723_v49  ;;  %v1742_v7 = vadd.f32 %v2099_v58, %v1740_v3 }
 0xaad   : > { %v1741_v9 = vmul.f32 %v2098_v56, %v1739_v6  ;;  %1748 = vst.msk [vmem:[#allocation3] sm:$0xff] %vm1051_vm3, %v1742_v7  ;;  %1745 = vst.msk [vmem:[#allocation20] sm:$0xff] %vm1051_vm3, %v1742_v7 }
 0xaaf   : > { %v1743_v10 = vadd.f32 %v2099_v58, %v1741_v9 }
 0xab1   : > { %1749 = vst.msk [vmem:[#allocation3 + $0x8] sm:$0xff] %vm1051_vm3, %v1743_v10  ;;  %1746 = vst.msk [vmem:[#allocation20 + $0x8] sm:$0xff] %vm1051_vm3, %v1743_v10 }
 0xab2   : > { %2751 = shalt.err (!%p2748_p13)
}
 0xab3   : > { %s3733_s19 = sld [smem:[#allocation48_spill]] }
 0xab9   : > { %s2752_s12 = scalar_lea.hbm %s3733_s19, 256 }
 0xaba   : > { %p2753_p4 = scmp.ne.s32.totalorder %s3733_s19, %s2752_s12  ;;  %p2758_p12 = scmp.lt.u32.totalorder %s2752_s12, %s3733_s19 }
 0xabc   : > { %p2754_p3 = pnand %p2753_p4, %p2304_p1 }
 0xabe   : > { %p2755_p0 = pneg %p2754_p3 }
 0xac0   : > { %p2760_p7 = pnand %p2758_p12, %p2755_p0 }
 0xac2   : > { %2763 = shalt.err (!%p2760_p7)
}
 0xac3   : > { %s2846_s11 = smov 128   ;;  %s2847_s17 = smov 8  }
 0xac4   : > { %2255 = dma.vmem_to_hbm [thread:$0]  (%p2304_p1), %s1768_s1, 256, %s3733_s19, [#allocation21], %s2846_s11, %s2846_s11, %s2847_s17  }
 0xac5   : > { %2801 = dma.done.wait (%p2304_p1), [#allocation6], 128  }
 0xac6   : > { %2803 = vsyncadd (%p2304_p1), [#allocation6], 4294967168 }
 0xac7   : > { %2805 = dma.done.wait (%p2304_p1), [#allocation21], 256  }
 0xac8   : > { %2807 = vsyncadd (%p2304_p1), [#allocation21], 4294967040 }
 0xac9 PF: > { %s3734_s30 = sld [smem:[#allocation31_spill]]  ;;  %s3735_s27 = sld [smem:[#allocation29_spill]] }
 0xaca   : > { %s3736_s28 = sld [smem:[#allocation30_spill]]  ;;  %s3737_s29 = sld [smem:[#allocation32_spill]] }
 0xacf   : > { %p31_p8 = scmp.ge.s32.totalorder %s3734_s30, 4  }
 0xad1   :  { %33 = sbr.rel (!%p31_p8) target bundleno = 22 (0x16), region = 230 }
 0xad8   :  { %1787 = vsyncpa [#allocation5], 1 }
 0xad9   :  { %1789 = vsyncpa [#allocation5 + $0x1], 1 }
 0xada   :  { %1790 = vsyncpa [#allocation8], 1 }
 0xadb   :  { %1791 = vsyncpa [#allocation18], 1 }
 0xadc   :  { %1792 = vsyncpa [#allocation6], 1 }
 0xadd   :  { %1794 = vsyncpa [#allocation6 + $0x1], 1 }
 0xade   :  { %1795 = vsyncpa [#allocation21], 1 }

</bundles_post_ra>
